<compile_context>
chip_gen: v5e
topology: v5e:2x2
jax: 0.10.0
libtpu: 0.0.40
codegen_flags: <defaults>
</compile_context>

<pallas_src>
import jax
import jax.numpy as jnp
from jax import lax
from jax.experimental import pallas as pl
from jax.experimental.pallas import tpu as pltpu


def aux_head_kernel(xc_ref, w1_ref, b1_ref, w2_ref, b2_ref, wc_ref, bc_ref,
                    out_ref):
    """One batch tile of the AuxiliaryHeadCIFAR forward.

    xc_ref : (TN*4, 25*C) f32  im2col of the raw input (pre-ReLU), row = (n, oh*2+ow)
    w1_ref : (25*C, 128)  bf16 folded (1/25 * conv1x1 * BN1-scale)
    b1_ref : (1, 128)     f32  BN1 folded bias
    w2_ref : (512, 768)   bf16 folded (conv2x2 * BN2-scale), rows (kh*2+kw)*128 + c
    b2_ref : (1, 768)     f32  BN2 folded bias
    wc_ref : (768, NCP)   bf16 classifier weight, columns zero-padded to NCP (=128k)
    bc_ref : (1, NCP)     f32  classifier bias, zero-padded
    out    : (TN, NCP)    f32
    """
    # ReLU (commutes with the im2col gather); pool+conv1+BN1-scale live in w1.
    xr = jnp.maximum(xc_ref[...], 0.0)

    h1 = jnp.dot(xr.astype(jnp.bfloat16), w1_ref[...],
                 preferred_element_type=jnp.float32)          # (TN*4, 128)
    h1 = jnp.maximum(h1 + b1_ref[...], 0.0)

    # 2x2 conv on the 2x2 map == matmul on rows regrouped per sample.
    h1f = h1.reshape(h1.shape[0] // 4, 4 * 128)               # (TN, 512)
    h2 = jnp.dot(h1f.astype(jnp.bfloat16), w2_ref[...],
                 preferred_element_type=jnp.float32)          # (TN, 768)
    h2 = jnp.maximum(h2 + b2_ref[...], 0.0)

    out = jnp.dot(h2.astype(jnp.bfloat16), wc_ref[...],
                  preferred_element_type=jnp.float32) + bc_ref[...]
    out_ref[...] = out.astype(out_ref.dtype)


def aux_head_forward(x, kernel_params, num_classes, block_n=256):
    """x: (N, C, 8, 8) NCHW f32. Returns (N, num_classes) f32."""
    N, C = x.shape[0], x.shape[1]
    w1p, b1, w2e, b2, wcp, bcp = kernel_params
    ncp = wcp.shape[1]

    # --- im2col in plain JAX (gather only; ReLU stays in the kernel) ---------
    # AvgPool2d(5, stride=3, pad=0) on 8x8 -> 2x2 output positions.
    cols = [x[:, :, oh * 3:oh * 3 + 5, ow * 3:ow * 3 + 5]      # (N, C, 5, 5)
            for oh in range(2) for ow in range(2)]
    # (N, 4, C, 5, 5) -> (N, 4, 5, 5, C) -> (N*4, 25*C); column = (kh*5+kw)*C + c
    xcol = jnp.stack(cols, axis=1).transpose(0, 1, 3, 4, 2).reshape(N * 4, 25 * C)

    # --- batch tiling ---------------------------------------------------------
    tn = min(block_n, N)
    n_pad = tn * pl.cdiv(N, tn)
    if n_pad != N:
        xcol = jnp.pad(xcol, ((0, (n_pad - N) * 4), (0, 0)))
    grid = (n_pad // tn,)

    out = pl.pallas_call(
        aux_head_kernel,
        out_shape=jax.ShapeDtypeStruct((n_pad, ncp), jnp.float32),
        grid_spec=pltpu.PrefetchScalarGridSpec(
            num_scalar_prefetch=0,
            grid=grid,
            in_specs=[
                pl.BlockSpec((tn * 4, 25 * C), lambda i: (i, 0)),
                pl.BlockSpec(w1p.shape, lambda i: (0, 0)),
                pl.BlockSpec(b1.shape, lambda i: (0, 0)),
                pl.BlockSpec(w2e.shape, lambda i: (0, 0)),
                pl.BlockSpec(b2.shape, lambda i: (0, 0)),
                pl.BlockSpec(wcp.shape, lambda i: (0, 0)),
                pl.BlockSpec(bcp.shape, lambda i: (0, 0)),
            ],
            out_specs=pl.BlockSpec((tn, ncp), lambda i: (i, 0)),
        ),
        compiler_params=pltpu.CompilerParams(
            dimension_semantics=("parallel",)),
    )(xcol, w1p, b1, w2e, b2, wcp, bcp)

    return out[:N, :num_classes]


def make_params(key, C, num_classes, eps=1e-5):
    """Deterministic synthetic parameters matching the PyTorch module shapes."""
    ks = jax.random.split(key, 12)
    # Conv2d(C, 128, 1, bias=False): weight (128, C, 1, 1)
    w1 = jax.random.normal(ks[0], (128, C, 1, 1), jnp.float32) * 0.1
    # BatchNorm2d(128)
    g1 = 1.0 + 0.1 * jax.random.normal(ks[1], (128,), jnp.float32)
    be1 = 0.1 * jax.random.normal(ks[2], (128,), jnp.float32)
    m1 = 0.1 * jax.random.normal(ks[3], (128,), jnp.float32)
    v1 = jnp.abs(jax.random.normal(ks[4], (128,), jnp.float32)) + 0.5
    # Conv2d(128, 768, 2, bias=False): weight (768, 128, 2, 2)
    w2 = jax.random.normal(ks[5], (768, 128, 2, 2), jnp.float32) * 0.05
    # BatchNorm2d(768)
    g2 = 1.0 + 0.1 * jax.random.normal(ks[6], (768,), jnp.float32)
    be2 = 0.1 * jax.random.normal(ks[7], (768,), jnp.float32)
    m2 = 0.1 * jax.random.normal(ks[8], (768,), jnp.float32)
    v2 = jnp.abs(jax.random.normal(ks[9], (768,), jnp.float32)) + 0.5
    # Linear(768, num_classes)
    wc = jax.random.normal(ks[10], (num_classes, 768), jnp.float32) * 0.05
    bc = 0.1 * jax.random.normal(ks[11], (num_classes,), jnp.float32)

    raw = dict(w1=w1, g1=g1, be1=be1, m1=m1, v1=v1,
               w2=w2, g2=g2, be2=be2, m2=m2, v2=v2, wc=wc, bc=bc)

    # ---- fold everything into lane-dense, bf16 matmul form ----
    s1 = g1 / jnp.sqrt(v1 + eps)
    b1 = be1 - m1 * s1
    s2 = g2 / jnp.sqrt(v2 + eps)
    b2 = be2 - m2 * s2

    # pool(1/25) + 1x1 conv + BN1 scale -> (25*C, 128); row = (kh*5+kw)*C + c
    w1_mm = w1.reshape(128, C).T                               # (C, 128)
    w1_pool = jnp.tile(w1_mm[None, :, :], (25, 1, 1)).reshape(25 * C, 128)
    w1_eff = (w1_pool * (s1[None, :] / 25.0)).astype(jnp.bfloat16)

    # 2x2 conv + BN2 scale -> (512, 768); row = (kh*2+kw)*128 + c
    w2_mm = jnp.transpose(w2, (2, 3, 1, 0)).reshape(4 * 128, 768)
    w2_eff = (w2_mm * s2[None, :]).astype(jnp.bfloat16)

    # classifier, columns padded to a lane-dense multiple of 128
    ncp = 128 * ((num_classes + 127) // 128)
    wc_pad = jnp.zeros((768, ncp), jnp.float32).at[:, :num_classes].set(wc.T)
    bc_pad = jnp.zeros((1, ncp), jnp.float32).at[:, :num_classes].set(bc)

    kernel_params = (
        w1_eff, b1.reshape(1, 128),
        w2_eff, b2.reshape(1, 768),
        wc_pad.astype(jnp.bfloat16), bc_pad,
    )
    return raw, kernel_params


def ref_forward(x, p, eps=1e-5):
    """Pure-JAX f32 reference using lax conv/pooling primitives (NCHW)."""
    xr = jnp.maximum(x, 0.0)
    pooled = lax.reduce_window(xr, 0.0, lax.add,
                               (1, 1, 5, 5), (1, 1, 3, 3), "VALID") / 25.0
    dn = ("NCHW", "OIHW", "NCHW")
    h = lax.conv_general_dilated(pooled, p["w1"], (1, 1), "VALID",
                                 dimension_numbers=dn,
                                 precision=lax.Precision.HIGHEST)
    s1 = p["g1"] / jnp.sqrt(p["v1"] + eps)
    b1 = p["be1"] - p["m1"] * s1
    h = jnp.maximum(h * s1[None, :, None, None] + b1[None, :, None, None], 0.0)
    h = lax.conv_general_dilated(h, p["w2"], (1, 1), "VALID",
                                 dimension_numbers=dn,
                                 precision=lax.Precision.HIGHEST)
    s2 = p["g2"] / jnp.sqrt(p["v2"] + eps)
    b2 = p["be2"] - p["m2"] * s2
    h = jnp.maximum(h * s2[None, :, None, None] + b2[None, :, None, None], 0.0)
    h = h.reshape(h.shape[0], -1)                              # (N, 768)
    return jnp.dot(h, p["wc"].T, precision=lax.Precision.HIGHEST) + p["bc"]


if __name__ == "__main__":
    N, C, H, W = 2, 4, 8, 8        # module assumes 8x8 spatial input
    num_classes = 10

    key = jax.random.PRNGKey(0)
    kx, kp = jax.random.split(key)
    x = jax.random.normal(kx, (N, C, H, W), jnp.float32)
    raw_params, kernel_params = make_params(kp, C, num_classes)

    out = jax.block_until_ready(aux_head_forward(x, kernel_params, num_classes))
    ref = jax.block_until_ready(ref_forward(x, raw_params))

    assert out.shape == (N, num_classes)
    # Kernel uses bf16 MXU operands (f32 accumulation); reference is full f32,
    # so compare at a bf16-appropriate tolerance.
    max_err = float(jnp.max(jnp.abs(out - ref)))
    assert jnp.allclose(out, ref, rtol=2e-2, atol=2e-2), f"max abs diff {max_err}"

    print("KERNEL_OK")
</pallas_src>

<mosaic_0001>
module attributes {stable_mosaic.version = 11 : i64} {
  func.func @aux_head_kernel(%arg0: i32, %arg1: memref<8x100xf32, #tpu.memory_space<vmem>>, %arg2: memref<100x128xbf16, #tpu.memory_space<vmem>>, %arg3: memref<1x128xf32, #tpu.memory_space<vmem>>, %arg4: memref<512x768xbf16, #tpu.memory_space<vmem>>, %arg5: memref<1x768xf32, #tpu.memory_space<vmem>>, %arg6: memref<768x128xbf16, #tpu.memory_space<vmem>>, %arg7: memref<1x128xf32, #tpu.memory_space<vmem>>, %arg8: memref<2x128xf32, #tpu.memory_space<vmem>>) attributes {dimension_semantics = [#tpu.dimension_semantics<parallel>], iteration_bounds = array<i64: 1>, scalar_prefetch = 0 : i64, scratch_operands = 0 : i64, tpu.core_type = #tpu.core_type<tc>, window_params = [{transform_indices = @transform_0, window_bounds = array<i64: 8, 100>}, {pipeline_mode = #tpu.pipeline_mode<synchronous>, transform_indices = @transform_1, window_bounds = array<i64: 100, 128>}, {pipeline_mode = #tpu.pipeline_mode<synchronous>, transform_indices = @transform_2, window_bounds = array<i64: 1, 128>}, {pipeline_mode = #tpu.pipeline_mode<synchronous>, transform_indices = @transform_3, window_bounds = array<i64: 512, 768>}, {pipeline_mode = #tpu.pipeline_mode<synchronous>, transform_indices = @transform_4, window_bounds = array<i64: 1, 768>}, {pipeline_mode = #tpu.pipeline_mode<synchronous>, transform_indices = @transform_5, window_bounds = array<i64: 768, 128>}, {pipeline_mode = #tpu.pipeline_mode<synchronous>, transform_indices = @transform_6, window_bounds = array<i64: 1, 128>}, {transform_indices = @transform_7, window_bounds = array<i64: 2, 128>}]} {
    %c0 = arith.constant 0 : index
    %c0_0 = arith.constant 0 : index
    %0 = vector.load %arg1[%c0, %c0_0] : memref<8x100xf32, #tpu.memory_space<vmem>>, vector<8x100xf32>
    %cst = arith.constant 0.000000e+00 : f32
    %1 = vector.broadcast %cst : f32 to vector<8x100xf32>
    %2 = arith.maximumf %0, %1 : vector<8x100xf32>
    %3 = arith.truncf %2 : vector<8x100xf32> to vector<8x100xbf16>
    %c0_1 = arith.constant 0 : index
    %c0_2 = arith.constant 0 : index
    %4 = vector.load %arg2[%c0_1, %c0_2] : memref<100x128xbf16, #tpu.memory_space<vmem>>, vector<100x128xbf16>
    %cst_3 = arith.constant dense<0.000000e+00> : vector<8x128xf32>
    %5 = tpu.matmul %3, %4, %cst_3 {dimension_numbers = #tpu.dot_dimension_numbers<[1], [0], [0], [1], [0, 0, 1, 1], [], []>} : vector<8x100xbf16>, vector<100x128xbf16>, vector<8x128xf32> -> vector<8x128xf32>
    %c0_4 = arith.constant 0 : index
    %c0_5 = arith.constant 0 : index
    %6 = vector.load %arg3[%c0_4, %c0_5] : memref<1x128xf32, #tpu.memory_space<vmem>>, vector<1x128xf32>
    %7 = vector.broadcast %6 : vector<1x128xf32> to vector<8x128xf32>
    %8 = arith.addf %5, %7 : vector<8x128xf32>
    %cst_6 = arith.constant 0.000000e+00 : f32
    %9 = vector.broadcast %cst_6 : f32 to vector<8x128xf32>
    %10 = arith.maximumf %8, %9 : vector<8x128xf32>
    %11 = vector.shape_cast %10 : vector<8x128xf32> to vector<2x512xf32>
    %12 = arith.truncf %11 : vector<2x512xf32> to vector<2x512xbf16>
    %c0_7 = arith.constant 0 : index
    %c0_8 = arith.constant 0 : index
    %13 = vector.load %arg4[%c0_7, %c0_8] : memref<512x768xbf16, #tpu.memory_space<vmem>>, vector<512x768xbf16>
    %cst_9 = arith.constant dense<0.000000e+00> : vector<2x768xf32>
    %14 = tpu.matmul %12, %13, %cst_9 {dimension_numbers = #tpu.dot_dimension_numbers<[1], [0], [0], [1], [0, 0, 1, 1], [], []>} : vector<2x512xbf16>, vector<512x768xbf16>, vector<2x768xf32> -> vector<2x768xf32>
    %c0_10 = arith.constant 0 : index
    %c0_11 = arith.constant 0 : index
    %15 = vector.load %arg5[%c0_10, %c0_11] : memref<1x768xf32, #tpu.memory_space<vmem>>, vector<1x768xf32>
    %16 = vector.broadcast %15 : vector<1x768xf32> to vector<2x768xf32>
    %17 = arith.addf %14, %16 : vector<2x768xf32>
    %cst_12 = arith.constant 0.000000e+00 : f32
    %18 = vector.broadcast %cst_12 : f32 to vector<2x768xf32>
    %19 = arith.maximumf %17, %18 : vector<2x768xf32>
    %20 = arith.truncf %19 : vector<2x768xf32> to vector<2x768xbf16>
    %c0_13 = arith.constant 0 : index
    %c0_14 = arith.constant 0 : index
    %21 = vector.load %arg6[%c0_13, %c0_14] : memref<768x128xbf16, #tpu.memory_space<vmem>>, vector<768x128xbf16>
    %cst_15 = arith.constant dense<0.000000e+00> : vector<2x128xf32>
    %22 = tpu.matmul %20, %21, %cst_15 {dimension_numbers = #tpu.dot_dimension_numbers<[1], [0], [0], [1], [0, 0, 1, 1], [], []>} : vector<2x768xbf16>, vector<768x128xbf16>, vector<2x128xf32> -> vector<2x128xf32>
    %c0_16 = arith.constant 0 : index
    %c0_17 = arith.constant 0 : index
    %23 = vector.load %arg7[%c0_16, %c0_17] : memref<1x128xf32, #tpu.memory_space<vmem>>, vector<1x128xf32>
    %24 = vector.broadcast %23 : vector<1x128xf32> to vector<2x128xf32>
    %25 = arith.addf %22, %24 : vector<2x128xf32>
    %c0_18 = arith.constant 0 : index
    %c0_19 = arith.constant 0 : index
    %26 = vector.load %arg8[%c0_18, %c0_19] : memref<2x128xf32, #tpu.memory_space<vmem>>, vector<2x128xf32>
    tpu.vector_store %arg8[%c0_18, %c0_19], %25 {strides = array<i32>} : memref<2x128xf32, #tpu.memory_space<vmem>>, vector<2x128xf32>,
    return
  }
  func.func @transform_0(%arg0: i32) -> (i32, i32) {
    %c0_i32 = arith.constant 0 : i32
    %c0_i32_0 = arith.constant 0 : i32
    return %arg0, %c0_i32 : i32, i32
  }
  func.func @transform_1(%arg0: i32) -> (i32, i32) {
    %c0_i32 = arith.constant 0 : i32
    %c0_i32_0 = arith.constant 0 : i32
    %c0_i32_1 = arith.constant 0 : i32
    return %c0_i32, %c0_i32_0 : i32, i32
  }
  func.func @transform_2(%arg0: i32) -> (i32, i32) {
    %c0_i32 = arith.constant 0 : i32
    %c0_i32_0 = arith.constant 0 : i32
    %c0_i32_1 = arith.constant 0 : i32
    return %c0_i32, %c0_i32_0 : i32, i32
  }
  func.func @transform_3(%arg0: i32) -> (i32, i32) {
    %c0_i32 = arith.constant 0 : i32
    %c0_i32_0 = arith.constant 0 : i32
    %c0_i32_1 = arith.constant 0 : i32
    return %c0_i32, %c0_i32_0 : i32, i32
  }
  func.func @transform_4(%arg0: i32) -> (i32, i32) {
    %c0_i32 = arith.constant 0 : i32
    %c0_i32_0 = arith.constant 0 : i32
    %c0_i32_1 = arith.constant 0 : i32
    return %c0_i32, %c0_i32_0 : i32, i32
  }
  func.func @transform_5(%arg0: i32) -> (i32, i32) {
    %c0_i32 = arith.constant 0 : i32
    %c0_i32_0 = arith.constant 0 : i32
    %c0_i32_1 = arith.constant 0 : i32
    return %c0_i32, %c0_i32_0 : i32, i32
  }
  func.func @transform_6(%arg0: i32) -> (i32, i32) {
    %c0_i32 = arith.constant 0 : i32
    %c0_i32_0 = arith.constant 0 : i32
    %c0_i32_1 = arith.constant 0 : i32
    return %c0_i32, %c0_i32_0 : i32, i32
  }
  func.func @transform_7(%arg0: i32) -> (i32, i32) {
    %c0_i32 = arith.constant 0 : i32
    %c0_i32_0 = arith.constant 0 : i32
    return %arg0, %c0_i32 : i32, i32
  }
}

</mosaic_0001>

<bundles_post_ra>
// kernel: tpu_custom_call.1
= control target key start
LH: loop header
LB: loop body
LE: loop exit
PB: predicated region body
PF: predicated region fallthrough
CT: control target
= control target key end

     0   :  { %12 = vsyncpa [#allocation3], 0  ;;  %s3695_s0 = inlined_call_operand.hbm [shape: f32[8,100], index: 0, kind: input, shape index: {}]   ;;  %s3696_s1 = inlined_call_operand.hbm [shape: bf16[100,128], index: 1, kind: input, shape index: {}]   ;;  %s3697_s2 = inlined_call_operand.vmem [shape: f32[1,128], index: 2, kind: input, shape index: {}]   ;;  %s3698_s3 = inlined_call_operand.hbm [shape: bf16[512,768], index: 3, kind: input, shape index: {}]   ;;  %s3699_s4 = inlined_call_operand.hbm [shape: f32[1,768], index: 4, kind: input, shape index: {}]   ;;  %s3700_s5 = inlined_call_operand.hbm [shape: bf16[768,128], index: 5, kind: input, shape index: {}]   ;;  %s3701_s6 = inlined_call_operand.vmem [shape: f32[1,128], index: 6, kind: input, shape index: {}]   ;;  %s3702_s7 = inlined_call_operand.hbm [shape: f32[2,128], index: 7, kind: output, shape index: {}]  }
   0x1   :  { %13 = vsyncpa [#allocation6], 0 }
   0x2   :  { %14 = vsyncpa [#allocation9], 0  ;;  %s31_s26 = sshll.u32 %s3696_s1, 4  ;;  %s32_s26 = int_to_ptr.hbm [resolvable:$true] %s31_s26 }
   0x3   :  { %15 = vsyncpa [#allocation4], 0  ;;  %s3573_s27 = smov [#allocation5]   ;;  %s60_s8 = sshll.u32 %s3699_s4, 4  ;;  %s61_s8 = int_to_ptr.hbm [resolvable:$true] %s60_s8 }
   0x4   :  { %s33_s28 = sshll.u32 %s3573_s27, 4  ;;  %s3574_s9 = smov 64   ;;  %s34_s28 = int_to_ptr.vmem [resolvable:$true] %s33_s28 }
   0x5   :  { %s3575_s10 = smov 4   ;;  %s3576_s11 = smov [#allocation8]  }
   0x6   :  { %39 = dma.hbm_to_vmem [thread:$0]  %s32_s26, 832, %s34_s28, [#allocation6], %s3574_s9, %s3574_s9, %s3575_s10  }
   0x7   :  { %s62_s12 = sshll.u32 %s3576_s11, 4  ;;  %s21_s14 = sshll.u32 %s3695_s0, 4  ;;  %s63_s12 = int_to_ptr.vmem [resolvable:$true] %s62_s12  ;;  %s22_s14 = int_to_ptr.hbm [resolvable:$true] %s21_s14 }
   0x8   :  { %65 = dma.hbm_to_vmem [thread:$0]  %s61_s8, 96, %s63_s12, [#allocation9]  }
   0x9   :  { %s46_s4 = sshll.u32 %s3698_s3, 4  ;;  %s3577_s17 = smov [#allocation2]   ;;  %s47_s4 = int_to_ptr.hbm [resolvable:$true] %s46_s4 }
   0xa   :  { %s23_s18 = sshll.u32 %s3577_s17, 4  ;;  %s3578_s19 = smov [#allocation7]   ;;  %s24_s18 = int_to_ptr.vmem [resolvable:$true] %s23_s18 }
   0xb   :  { %26 = dma.hbm_to_vmem [thread:$0]  %s22_s14, 128, %s24_s18, [#allocation3]  }
   0xc   :  { %s48_s20 = sshll.u32 %s3578_s19, 4  ;;  %s3579_s21 = smov 384   ;;  %s49_s20 = int_to_ptr.vmem [resolvable:$true] %s48_s20 }
   0xd   :  { %s3580_s22 = smov 24   ;;  %s70_s24 = sshll.u32 %s3700_s5, 4  ;;  %s71_s24 = int_to_ptr.hbm [resolvable:$true] %s70_s24 }
   0xe   :  { %54 = dma.hbm_to_vmem [thread:$0]  %s47_s4, 24576, %s49_s20, [#allocation6], %s3579_s21, %s3579_s21, %s3580_s22  }
   0xf   :  { %s3581_s25 = smov [#allocation10]  }
  0x10   :  { %s72_s26 = sshll.u32 %s3581_s25, 4  ;;  %s73_s26 = int_to_ptr.vmem [resolvable:$true] %s72_s26 }
  0x11   :  { %78 = dma.hbm_to_vmem [thread:$0]  %s71_s24, 6144, %s73_s26, [#allocation9], %s3574_s9, %s3574_s9, %s3575_s10  }
  0x12   :  { %3565 = dma.done.wait [#allocation3], 128  }
  0x13   :  { %3566 = vsyncadd [#allocation3], 4294967168 }
  0x14   :  { %3567 = dma.done.wait [#allocation6], 25408  }
  0x15   :  { %3568 = vsyncadd [#allocation6], 4294941888 }
  0x16   :  { %3569 = dma.done.wait [#allocation9], 6240  }
  0x17   :  { %3570 = vsyncadd [#allocation9], 4294961056  ;;  %v117_v0 = vld [vmem:[#allocation5 + $0x30] sm:$0x3]  ;;  %vm165_vm0 = vcmask 1041408   ;;  %v3167_v11 = vld [vmem:[#allocation5 + $0x28] sm:$0xff] }
  0x18   :  { %v147_v1 = vunpack.c.l.b16 %v117_v0  ;;  %v2372_v2 = vld [vmem:[#allocation7 + $0x150] sm:$0xf]  ;;  %v3213_v4 = vld [vmem:[#allocation7 + $0x164] sm:$0xf0]  ;;  %v2348_v14 = vld [vmem:[#allocation7 + $0x120] sm:$0xf] }
  0x19   :  { %v2564_v5 = vld [vmem:[#allocation7 + $0x2d0] sm:$0xf]  ;;  %v2373_v6 = vor.u32 %v3213_v4, %v2372_v2  ;;  %v3261_v7 = vld [vmem:[#allocation7 + $0x2e4] sm:$0xf0]  ;;  %v3207_v15 = vld [vmem:[#allocation7 + $0x134] sm:$0xf0] }
  0x1a   :  { %v154_v3 = vpack.c.b16 %v147_v1, %v147_v1  ;;  %v2756_v8 = vld [vmem:[#allocation7 + $0x450] sm:$0xf]  ;;  %v3309_v9 = vld [vmem:[#allocation7 + $0x464] sm:$0xf0]  ;;  %v2565_v12 = vor.u32 %v3261_v7, %v2564_v5  ;;  %v2540_v16 = vld [vmem:[#allocation7 + $0x2a0] sm:$0xf]  ;;  %v2349_v17 = vor.u32 %v3207_v15, %v2348_v14 }
  0x1b   :  { %v2757_v13 = vor.u32 %v3309_v9, %v2756_v8  ;;  %1367 = vmatpush.bf16.msra.mxu1 %v2373_v6  ;;  %v3255_v18 = vld [vmem:[#allocation7 + $0x2b4] sm:$0xf0]  ;;  %v2732_v19 = vld [vmem:[#allocation7 + $0x420] sm:$0xf]  ;;  %v2324_v23 = vld [vmem:[#allocation7 + $0xf0] sm:$0xf] }
  0x1c   :  { %v167_v10 = vsel %vm165_vm0, %v154_v3, 0  ;;  %1380 = vmatpush.bf16.msra.mxu2 %v2565_v12  ;;  %v3303_v20 = vld [vmem:[#allocation7 + $0x434] sm:$0xf0]  ;;  %v2541_v21 = vor.u32 %v3255_v18, %v2540_v16  ;;  %v3201_v24 = vld [vmem:[#allocation7 + $0x104] sm:$0xf0]  ;;  %v3166_v27 = vld [vmem:[#allocation5 + $0x20] sm:$0xff] }
  0x1d   :  { %170 = vmatpush.bf16.msra.mxu0 %v167_v10  ;;  %1393 = vmatpush.bf16.msra.mxu3 %v2757_v13  ;;  %v2733_v22 = vor.u32 %v3303_v20, %v2732_v19  ;;  %v2516_v25 = vld [vmem:[#allocation7 + $0x270] sm:$0xf]  ;;  %v3249_v26 = vld [vmem:[#allocation7 + $0x284] sm:$0xf0]  ;;  %v2325_v28 = vor.u32 %v3201_v24, %v2324_v23  ;;  %v2300_v33 = vld [vmem:[#allocation7 + $0xc0] sm:$0xf] }
  0x1e   :  { %v2708_v29 = vld [vmem:[#allocation7 + $0x3f0] sm:$0xf]  ;;  %v3297_v30 = vld [vmem:[#allocation7 + $0x404] sm:$0xf0]  ;;  %v2517_v31 = vor.u32 %v3249_v26, %v2516_v25  ;;  %v3195_v34 = vld [vmem:[#allocation7 + $0xd4] sm:$0xf0] }
  0x1f   :  { %1368 = vmatpush.bf16.msra.mxu1 %v2349_v17  ;;  %v2709_v32 = vor.u32 %v3297_v30, %v2708_v29  ;;  %v2492_v35 = vld [vmem:[#allocation7 + $0x240] sm:$0xf]  ;;  %v3243_v36 = vld [vmem:[#allocation7 + $0x254] sm:$0xf0]  ;;  %v3165_v39 = vld [vmem:[#allocation5 + $0x18] sm:$0xff]  ;;  %v2301_v40 = vor.u32 %v3195_v34, %v2300_v33  ;;  %vm161_vm1 = vcmask 818176  }
  0x20   :  { %1381 = vmatpush.bf16.msra.mxu2 %v2541_v21  ;;  %v2684_v37 = vld [vmem:[#allocation7 + $0x3c0] sm:$0xf]  ;;  %v3291_v38 = vld [vmem:[#allocation7 + $0x3d4] sm:$0xf0]  ;;  %v2493_v41 = vor.u32 %v3243_v36, %v2492_v35  ;;  %v2276_v43 = vld [vmem:[#allocation7 + $0x90] sm:$0xf] }
  0x21   :  { %171 = vmatpush.bf16.msra.mxu0 %v3167_v11  ;;  %1394 = vmatpush.bf16.msra.mxu3 %v2733_v22  ;;  %v2685_v42 = vor.u32 %v3291_v38, %v2684_v37  ;;  %v3189_v44 = vld [vmem:[#allocation7 + $0xa4] sm:$0xf0]  ;;  %v2468_v45 = vld [vmem:[#allocation7 + $0x210] sm:$0xf]  ;;  %v3164_v49 = vld [vmem:[#allocation5 + $0x10] sm:$0xff]  ;;  %s3583_s28 = smov [#allocation11]  }
  0x22   :  { %v3237_v46 = vld [vmem:[#allocation7 + $0x224] sm:$0xf0]  ;;  %v2660_v47 = vld [vmem:[#allocation7 + $0x390] sm:$0xf]  ;;  %v2277_v50 = vor.u32 %v3189_v44, %v2276_v43  ;;  %v2252_v53 = vld [vmem:[#allocation7 + $0x60] sm:$0xf] }
  0x23   :  { %1369 = vmatpush.bf16.msra.mxu1 %v2325_v28  ;;  %v3285_v48 = vld [vmem:[#allocation7 + $0x3a4] sm:$0xf0]  ;;  %v2469_v51 = vor.u32 %v3237_v46, %v2468_v45  ;;  %v3183_v54 = vld [vmem:[#allocation7 + $0x74] sm:$0xf0]  ;;  %v2444_v55 = vld [vmem:[#allocation7 + $0x1e0] sm:$0xf] }
  0x24   :  { %1382 = vmatpush.bf16.msra.mxu2 %v2517_v31  ;;  %v2661_v52 = vor.u32 %v3285_v48, %v2660_v47  ;;  %v3231_v56 = vld [vmem:[#allocation7 + $0x1f4] sm:$0xf0]  ;;  %v2636_v57 = vld [vmem:[#allocation7 + $0x360] sm:$0xf]  ;;  %v102_v60 = vld [vmem:[#allocation2] sm:$0xff]  ;;  %v2253_v61 = vor.u32 %v3183_v54, %v2252_v53  ;;  %s2163_s29 = sshll.u32 %s3583_s28, 4  ;;  %s2164_s29 = int_to_ptr.vmem [resolvable:$true] %s2163_s29 }
  0x25   :  { %172 = vmatpush.bf16.msra.mxu0 %v3166_v27  ;;  %1395 = vmatpush.bf16.msra.mxu3 %v2709_v32  ;;  %v3279_v58 = vld [vmem:[#allocation7 + $0x374] sm:$0xf0]  ;;  %v2948_v62 = vld [vmem:[#allocation7 + $0x5d0] sm:$0xf]  ;;  %v2445_v63 = vor.u32 %v3231_v56, %v2444_v55  ;;  %v3177_v2 = vld [vmem:[#allocation7 + $0x44] sm:$0xf0] }
  0x26   :  { %v3163_v59 = vld [vmem:[#allocation5 + $0x8] sm:$0xff]  ;;  %v2637_v0 = vor.u32 %v3279_v58, %v2636_v57  ;;  %v2228_v1 = vld [vmem:[#allocation7 + $0x30] sm:$0xf]  ;;  %v3357_v3 = vld [vmem:[#allocation7 + $0x5e4] sm:$0xf0]  ;;  %v103_v6 = vmax.f32 %v102_v60, 0.0 }
  0x27   :  { %1370 = vmatpush.bf16.msra.mxu1 %v2301_v40  ;;  %v2420_v4 = vld [vmem:[#allocation7 + $0x1b0] sm:$0xf]  ;;  %v3225_v5 = vld [vmem:[#allocation7 + $0x1c4] sm:$0xf0]  ;;  %v2924_v10 = vld [vmem:[#allocation7 + $0x5a0] sm:$0xf]  ;;  %v2229_v12 = vor.u32 %v3177_v2, %v2228_v1  ;;  %v2949_v13 = vor.u32 %v3357_v3, %v2948_v62 }
  0x28   :  { %1383 = vmatpush.bf16.msra.mxu2 %v2493_v41  ;;  %v2612_v7 = vld [vmem:[#allocation7 + $0x330] sm:$0xf]  ;;  %v3273_v8 = vld [vmem:[#allocation7 + $0x344] sm:$0xf0]  ;;  %v3351_v11 = vld [vmem:[#allocation7 + $0x5b4] sm:$0xf0]  ;;  %v2421_v14 = vor.u32 %v3225_v5, %v2420_v4  ;;  %v104_v22 = vpack.c.bf16 %v103_v6, %v103_v6 }
  0x29   :  { %173 = vmatpush.bf16.msra.mxu0 %v3165_v39  ;;  %1396 = vmatpush.bf16.msra.mxu3 %v2685_v42  ;;  %v3162_v9 = vld [vmem:[#allocation5] sm:$0xff]  ;;  %v2204_v15 = vld [vmem:[#allocation7] sm:$0xf]  ;;  %v3171_v16 = vld [vmem:[#allocation7 + $0x14] sm:$0xf0]  ;;  %v2613_v18 = vor.u32 %v3273_v8, %v2612_v7  ;;  %v2925_v30 = vor.u32 %v3351_v11, %v2924_v10  ;;  %s2165_s9 = sshll.u32 %s3702_s7, 4  ;;  %s2166_s9 = int_to_ptr.hbm [resolvable:$true] %s2165_s9 }
  0x2a   :  { %v2396_v17 = vld [vmem:[#allocation7 + $0x180] sm:$0xf]  ;;  %v3219_v19 = vld [vmem:[#allocation7 + $0x194] sm:$0xf0]  ;;  %v3210_v23 = vld [vmem:[#allocation7 + $0x154] sm:$0xf]  ;;  %v2205_v26 = vor.u32 %v3171_v16, %v2204_v15 }
  0x2b   :  { %1371 = vmatpush.bf16.msra.mxu1 %v2277_v50  ;;  %v2588_v20 = vld [vmem:[#allocation7 + $0x300] sm:$0xf]  ;;  %v3267_v21 = vld [vmem:[#allocation7 + $0x314] sm:$0xf0]  ;;  %v2374_v24 = vld [vmem:[#allocation7 + $0x168] sm:$0xf0]  ;;  %v2397_v31 = vor.u32 %v3219_v19, %v2396_v17 }
  0x2c   :  { %1384 = vmatpush.bf16.msra.mxu2 %v2469_v51  ;;  %v3258_v25 = vld [vmem:[#allocation7 + $0x2d4] sm:$0xf]  ;;  %v2566_v27 = vld [vmem:[#allocation7 + $0x2e8] sm:$0xf0]  ;;  %v2900_v32 = vld [vmem:[#allocation7 + $0x570] sm:$0xf]  ;;  %v2589_v34 = vor.u32 %v3267_v21, %v2588_v20  ;;  %v2377_v35 = vor.u32 %v3210_v23, %v2374_v24 }
  0x2d   :  { %174 = vmatpush.bf16.msra.mxu0 %v3164_v49  ;;  %1397 = vmatpush.bf16.msra.mxu3 %v2661_v52  ;;  %v3306_v28 = vld [vmem:[#allocation7 + $0x454] sm:$0xf]  ;;  %v2758_v29 = vld [vmem:[#allocation7 + $0x468] sm:$0xf0]  ;;  %v3345_v33 = vld [vmem:[#allocation7 + $0x584] sm:$0xf0]  ;;  %v2569_v36 = vor.u32 %v3258_v25, %v2566_v27 }
  0x2e   :  { %v2761_v37 = vor.u32 %v3306_v28, %v2758_v29  ;;  %v3204_v38 = vld [vmem:[#allocation7 + $0x124] sm:$0xf]  ;;  %v2350_v39 = vld [vmem:[#allocation7 + $0x138] sm:$0xf0]  ;;  %v2901_v44 = vor.u32 %v3345_v33, %v2900_v32  ;;  %v2876_v45 = vld [vmem:[#allocation7 + $0x540] sm:$0xf] }
  0x2f   :  { %1372 = vmatpush.bf16.msra.mxu1 %v2253_v61  ;;  %v3252_v40 = vld [vmem:[#allocation7 + $0x2a4] sm:$0xf]  ;;  %v2542_v41 = vld [vmem:[#allocation7 + $0x2b8] sm:$0xf0]  ;;  %v3339_v46 = vld [vmem:[#allocation7 + $0x554] sm:$0xf0]  ;;  %v2353_v47 = vor.u32 %v3204_v38, %v2350_v39 }
  0x30   :  { %1385 = vmatpush.bf16.msra.mxu2 %v2445_v63  ;;  %v3300_v42 = vld [vmem:[#allocation7 + $0x424] sm:$0xf]  ;;  %v2734_v43 = vld [vmem:[#allocation7 + $0x438] sm:$0xf0]  ;;  %v2545_v48 = vor.u32 %v3252_v40, %v2542_v41  ;;  %v3198_v50 = vld [vmem:[#allocation7 + $0xf4] sm:$0xf]  ;;  %v2877_v56 = vor.u32 %v3339_v46, %v2876_v45 }
  0x31   :  { %175 = vmatpush.bf16.msra.mxu0 %v3163_v59  ;;  %1398 = vmatpush.bf16.msra.mxu3 %v2637_v0  ;;  %v2737_v49 = vor.u32 %v3300_v42, %v2734_v43  ;;  %v2326_v51 = vld [vmem:[#allocation7 + $0x108] sm:$0xf0]  ;;  %v3246_v52 = vld [vmem:[#allocation7 + $0x274] sm:$0xf]  ;;  %v2852_v57 = vld [vmem:[#allocation7 + $0x510] sm:$0xf] }
  0x32   :  { %v2518_v53 = vld [vmem:[#allocation7 + $0x288] sm:$0xf0]  ;;  %v3294_v54 = vld [vmem:[#allocation7 + $0x3f4] sm:$0xf]  ;;  %v3333_v58 = vld [vmem:[#allocation7 + $0x524] sm:$0xf0]  ;;  %v2329_v59 = vor.u32 %v3198_v50, %v2326_v51 }
  0x33   :  { %1373 = vmatpush.bf16.msra.mxu1 %v2229_v12  ;;  %v2710_v55 = vld [vmem:[#allocation7 + $0x408] sm:$0xf0]  ;;  %v2521_v60 = vor.u32 %v3246_v52, %v2518_v53  ;;  %v2853_v62 = vor.u32 %v3333_v58, %v2852_v57  ;;  %v2828_v63 = vld [vmem:[#allocation7 + $0x4e0] sm:$0xf]  ;;  %v3327_v0 = vld [vmem:[#allocation7 + $0x4f4] sm:$0xf0] }
  0x34   :  { %1386 = vmatpush.bf16.msra.mxu2 %v2421_v14  ;;  %v2713_v61 = vor.u32 %v3294_v54, %v2710_v55  ;;  %v2829_v1 = vor.u32 %v3327_v0, %v2828_v63  ;;  %v2804_v2 = vld [vmem:[#allocation7 + $0x4b0] sm:$0xf]  ;;  %v3321_v3 = vld [vmem:[#allocation7 + $0x4c4] sm:$0xf0]  ;;  %v2780_v5 = vld [vmem:[#allocation7 + $0x480] sm:$0xf] }
  0x35   :  { %176 = vmatpush.bf16.msra.mxu0 %v3162_v9  ;;  %1399 = vmatpush.bf16.msra.mxu3 %v2613_v18  ;;  %v2805_v4 = vor.u32 %v3321_v3, %v2804_v2  ;;  %v3315_v6 = vld [vmem:[#allocation7 + $0x494] sm:$0xf0]  ;;  %v3354_v7 = vld [vmem:[#allocation7 + $0x5d4] sm:$0xf]  ;;  %v2950_v8 = vld [vmem:[#allocation7 + $0x5e8] sm:$0xf0] }
  0x36   :  { %v2781_v9 = vor.u32 %v3315_v6, %v2780_v5  ;;  %v2953_v10 = vor.u32 %v3354_v7, %v2950_v8  ;;  %v3348_v11 = vld [vmem:[#allocation7 + $0x5a4] sm:$0xf]  ;;  %v2926_v12 = vld [vmem:[#allocation7 + $0x5b8] sm:$0xf0]  ;;  %v3342_v14 = vld [vmem:[#allocation7 + $0x574] sm:$0xf] }
  0x37   :  { %1374 = vmatpush.bf16.msra.mxu1 %v2205_v26  ;;  %v2902_v15 = vld [vmem:[#allocation7 + $0x588] sm:$0xf0]  ;;  %v3192_v17 = vld [vmem:[#allocation7 + $0xc4] sm:$0xf]  ;;  %v2302_v18 = vld [vmem:[#allocation7 + $0xd8] sm:$0xf0] }
  0x38   :  { %2201 = vmatmul.msk.bf16.vlgmr.msra.gmra.mxu0 %vm161_vm1, %v104_v22  ;;  %1387 = vmatpush.bf16.msra.mxu2 %v2397_v31  ;;  %v2905_v16 = vor.u32 %v3342_v14, %v2902_v15  ;;  %v3240_v19 = vld [vmem:[#allocation7 + $0x244] sm:$0xf]  ;;  %v2305_v20 = vor.u32 %v3192_v17, %v2302_v18  ;;  %v2494_v21 = vld [vmem:[#allocation7 + $0x258] sm:$0xf0]  ;;  %v3186_v29 = vld [vmem:[#allocation7 + $0x94] sm:$0xf] }
  0x39   :  { %1406 = vmatpush.bf16.msrb.mxu0 %v2949_v13  ;;  %1400 = vmatpush.bf16.msra.mxu3 %v2589_v34  ;;  %v2929_v13 = vor.u32 %v3348_v11, %v2926_v12  ;;  %v3288_v22 = vld [vmem:[#allocation7 + $0x3c4] sm:$0xf]  ;;  %v2686_v23 = vld [vmem:[#allocation7 + $0x3d8] sm:$0xf0]  ;;  %v2497_v24 = vor.u32 %v3240_v19, %v2494_v21  ;;  %v3234_v31 = vld [vmem:[#allocation7 + $0x214] sm:$0xf] }
  0x3a   :  { %v2689_v25 = vor.u32 %v3288_v22, %v2686_v23  ;;  %v3336_v26 = vld [vmem:[#allocation7 + $0x544] sm:$0xf]  ;;  %v2878_v27 = vld [vmem:[#allocation7 + $0x558] sm:$0xf0]  ;;  %v2470_v33 = vld [vmem:[#allocation7 + $0x228] sm:$0xf0] }
  0x3b   :  { %1419 = vmatpush.bf16.msrb.mxu1 %v2377_v35  ;;  %v2881_v28 = vor.u32 %v3336_v26, %v2878_v27  ;;  %v3282_v34 = vld [vmem:[#allocation7 + $0x394] sm:$0xf]  ;;  %v2662_v35 = vld [vmem:[#allocation7 + $0x3a8] sm:$0xf0]  ;;  %v3180_v41 = vld [vmem:[#allocation7 + $0x64] sm:$0xf] }
  0x3c   :  { %1432 = vmatpush.bf16.msrb.mxu2 %v2569_v36  ;;  %v2473_v36 = vor.u32 %v3234_v31, %v2470_v33  ;;  %v3330_v38 = vld [vmem:[#allocation7 + $0x514] sm:$0xf]  ;;  %v2854_v39 = vld [vmem:[#allocation7 + $0x528] sm:$0xf0]  ;;  %v2254_v42 = vld [vmem:[#allocation7 + $0x78] sm:$0xf0] }
  0x3d   :  { %1407 = vmatpush.bf16.msrb.mxu0 %v2925_v30  ;;  %1445 = vmatpush.bf16.msrb.mxu3 %v2761_v37  ;;  %v2278_v30 = vld [vmem:[#allocation7 + $0xa8] sm:$0xf0]  ;;  %v2665_v37 = vor.u32 %v3282_v34, %v2662_v35  ;;  %v2857_v40 = vor.u32 %v3330_v38, %v2854_v39  ;;  %v3228_v43 = vld [vmem:[#allocation7 + $0x1e4] sm:$0xf]  ;;  %v2446_v45 = vld [vmem:[#allocation7 + $0x1f8] sm:$0xf0] }
  0x3e   :  { %v2281_v32 = vor.u32 %v3186_v29, %v2278_v30  ;;  %v3276_v46 = vld [vmem:[#allocation7 + $0x364] sm:$0xf]  ;;  %v2830_v51 = vld [vmem:[#allocation7 + $0x4f8] sm:$0xf0]  ;;  %v3174_v53 = vld [vmem:[#allocation7 + $0x34] sm:$0xf] }
  0x3f   :  { %1420 = vmatpush.bf16.msrb.mxu1 %v2353_v47  ;;  %v2638_v47 = vld [vmem:[#allocation7 + $0x378] sm:$0xf0]  ;;  %v3324_v50 = vld [vmem:[#allocation7 + $0x4e4] sm:$0xf]  ;;  %v2230_v54 = vld [vmem:[#allocation7 + $0x48] sm:$0xf0] }
  0x40   :  { %1433 = vmatpush.bf16.msrb.mxu2 %v2545_v48  ;;  %v2449_v48 = vor.u32 %v3228_v43, %v2446_v45  ;;  %v2833_v52 = vor.u32 %v3324_v50, %v2830_v51  ;;  %v3222_v55 = vld [vmem:[#allocation7 + $0x1b4] sm:$0xf]  ;;  %v2422_v57 = vld [vmem:[#allocation7 + $0x1c8] sm:$0xf0]  ;;  %v3168_v0 = vld [vmem:[#allocation7 + $0x4] sm:$0xf] }
  0x41   :  { %1408 = vmatpush.bf16.msrb.mxu0 %v2901_v44  ;;  %1446 = vmatpush.bf16.msrb.mxu3 %v2737_v49  ;;  %v2257_v44 = vor.u32 %v3180_v41, %v2254_v42  ;;  %v2641_v49 = vor.u32 %v3276_v46, %v2638_v47  ;;  %v3270_v58 = vld [vmem:[#allocation7 + $0x334] sm:$0xf]  ;;  %v2806_v63 = vld [vmem:[#allocation7 + $0x4c8] sm:$0xf0]  ;;  %v2206_v2 = vld [vmem:[#allocation7 + $0x18] sm:$0xf0] }
  0x42   :  { %v3216_v3 = vld [vmem:[#allocation7 + $0x184] sm:$0xf]  ;;  %v2209_v5 = vor.u32 %v3168_v0, %v2206_v2  ;;  %v2590_v7 = vld [vmem:[#allocation7 + $0x318] sm:$0xf0]  ;;  %v3582_v14 = vmov 1935823168  }
  0x43   :  { %1421 = vmatpush.bf16.msrb.mxu1 %v2329_v59  ;;  %v2614_v59 = vld [vmem:[#allocation7 + $0x348] sm:$0xf0]  ;;  %v3264_v6 = vld [vmem:[#allocation7 + $0x304] sm:$0xf]  ;;  %v2782_v11 = vld [vmem:[#allocation7 + $0x498] sm:$0xf0]  ;;  %v184_v15 = vunpack.c.l.s4 %v3582_v14 }
  0x44   :  { %1434 = vmatpush.bf16.msrb.mxu2 %v2521_v60  ;;  %v2425_v60 = vor.u32 %v3222_v55, %v2422_v57  ;;  %v3312_v8 = vld [vmem:[#allocation7 + $0x484] sm:$0xf]  ;;  %v2380_v22 = vld [vmem:[#allocation7 + $0x158] sm:$0xf]  ;;  %v3214_v23 = vld [vmem:[#allocation7 + $0x16c] sm:$0xf0] }
  0x45   :  { %1409 = vmatpush.bf16.msrb.mxu0 %v2877_v56  ;;  %1447 = vmatpush.bf16.msrb.mxu3 %v2713_v61  ;;  %v2233_v56 = vor.u32 %v3174_v53, %v2230_v54  ;;  %v2617_v61 = vor.u32 %v3270_v58, %v2614_v59  ;;  %v2785_v12 = vor.u32 %v3312_v8, %v2782_v11  ;;  %v185_v18 = vunpack.c.0.s8 %v184_v15  ;;  %v2764_v26 = vld [vmem:[#allocation7 + $0x458] sm:$0xf]  ;;  %v3310_v27 = vld [vmem:[#allocation7 + $0x46c] sm:$0xf0]  ;;  %v3208_v33 = vld [vmem:[#allocation7 + $0x13c] sm:$0xf0] }
  0x46   :  { %v3358_v29 = vld [vmem:[#allocation7 + $0x5ec] sm:$0xf0]  ;;  %v2381_v38 = vor.u32 %v3214_v23, %v2380_v22  ;;  %v2765_v42 = vor.u32 %v3310_v27, %v2764_v26  ;;  %v3256_v45 = vld [vmem:[#allocation7 + $0x2bc] sm:$0xf0]  ;;  %v2740_v46 = vld [vmem:[#allocation7 + $0x428] sm:$0xf] }
  0x47   :  { %1422 = vmatpush.bf16.msrb.mxu1 %v2305_v20  ;;  %v3304_v47 = vld [vmem:[#allocation7 + $0x43c] sm:$0xf0]  ;;  %v3202_v53 = vld [vmem:[#allocation7 + $0x10c] sm:$0xf0]  ;;  %v2716_v58 = vld [vmem:[#allocation7 + $0x3f8] sm:$0xf] }
  0x48   :  { %1435 = vmatpush.bf16.msrb.mxu2 %v2497_v24  ;;  %v2572_v24 = vld [vmem:[#allocation7 + $0x2d8] sm:$0xf]  ;;  %v2741_v54 = vor.u32 %v3304_v47, %v2740_v46  ;;  %v3250_v57 = vld [vmem:[#allocation7 + $0x28c] sm:$0xf0]  ;;  %v2308_v0 = vld [vmem:[#allocation7 + $0xc8] sm:$0xf] }
  0x49   :  { %1410 = vmatpush.bf16.msrb.mxu0 %v2853_v62  ;;  %1448 = vmatpush.bf16.msrb.mxu3 %v2689_v25  ;;  %v3318_v62 = vld [vmem:[#allocation7 + $0x4b4] sm:$0xf]  ;;  %v3262_v25 = vld [vmem:[#allocation7 + $0x2ec] sm:$0xf0]  ;;  %v2884_v8 = vld [vmem:[#allocation7 + $0x548] sm:$0xf] }
  0x4a   :  { %v2573_v39 = vor.u32 %v3262_v25, %v2572_v24  ;;  %v3298_v59 = vld [vmem:[#allocation7 + $0x40c] sm:$0xf0]  ;;  %v2260_v24 = vld [vmem:[#allocation7 + $0x68] sm:$0xf]  ;;  %v3184_v25 = vld [vmem:[#allocation7 + $0x7c] sm:$0xf0] }
  0x4b   :  { %1423 = vmatpush.bf16.msrb.mxu1 %v2281_v32  ;;  %v2356_v32 = vld [vmem:[#allocation7 + $0x128] sm:$0xf]  ;;  %v2717_v2 = vor.u32 %v3298_v59, %v2716_v58  ;;  %v2620_v46 = vld [vmem:[#allocation7 + $0x338] sm:$0xf]  ;;  %v3274_v47 = vld [vmem:[#allocation7 + $0x34c] sm:$0xf0] }
  0x4c   :  { %1436 = vmatpush.bf16.msrb.mxu2 %v2473_v36  ;;  %v2357_v50 = vor.u32 %v3208_v33, %v2356_v32  ;;  %v2836_v32 = vld [vmem:[#allocation7 + $0x4e8] sm:$0xf]  ;;  %v3328_v33 = vld [vmem:[#allocation7 + $0x4fc] sm:$0xf0] }
  0x4d   :  { %1411 = vmatpush.bf16.msrb.mxu0 %v2829_v1  ;;  %1449 = vmatpush.bf16.msrb.mxu3 %v2665_v37  ;;  %v2809_v1 = vor.u32 %v3318_v62, %v2806_v63  ;;  %v2596_v58 = vld [vmem:[#allocation7 + $0x308] sm:$0xf]  ;;  %v3268_v59 = vld [vmem:[#allocation7 + $0x31c] sm:$0xf0] }
  0x4f   :  { %1424 = vmatpush.bf16.msrb.mxu1 %v2257_v44  ;;  %v2548_v44 = vld [vmem:[#allocation7 + $0x2a8] sm:$0xf] }
  0x50   :  { %1437 = vmatpush.bf16.msrb.mxu2 %v2449_v48  ;;  %v2932_v48 = vld [vmem:[#allocation7 + $0x5a8] sm:$0xf]  ;;  %v2549_v51 = vor.u32 %v3256_v45, %v2548_v44  ;;  %v2428_v44 = vld [vmem:[#allocation7 + $0x1b8] sm:$0xf]  ;;  %v3226_v45 = vld [vmem:[#allocation7 + $0x1cc] sm:$0xf0] }
  0x51   :  { %1412 = vmatpush.bf16.msrb.mxu0 %v2805_v4  ;;  %1450 = vmatpush.bf16.msrb.mxu3 %v2641_v49  ;;  %v2398_v4 = vld [vmem:[#allocation7 + $0x198] sm:$0xf0]  ;;  %v3352_v49 = vld [vmem:[#allocation7 + $0x5bc] sm:$0xf0] }
  0x52   :  { %v2933_v55 = vor.u32 %v3352_v49, %v2932_v48  ;;  %v2812_v48 = vld [vmem:[#allocation7 + $0x4b8] sm:$0xf]  ;;  %v3322_v49 = vld [vmem:[#allocation7 + $0x4cc] sm:$0xf0] }
  0x53   :  { %1425 = vmatpush.bf16.msrb.mxu1 %v2233_v56  ;;  %v2524_v56 = vld [vmem:[#allocation7 + $0x278] sm:$0xf] }
  0x54   :  { %1438 = vmatpush.bf16.msrb.mxu2 %v2425_v60  ;;  %v2908_v60 = vld [vmem:[#allocation7 + $0x578] sm:$0xf]  ;;  %v2525_v63 = vor.u32 %v3250_v57, %v2524_v56  ;;  %v2621_v56 = vor.u32 %v3274_v47, %v2620_v46  ;;  %v2813_v57 = vor.u32 %v3322_v49, %v2812_v48  ;;  %v3289_v46 = vld [vmem:[#allocation7 + $0x3cc] sm:$0xf]  ;;  %v2694_v47 = vld [vmem:[#allocation7 + $0x3e0] sm:$0xf0] }
  0x55   :  { %1413 = vmatpush.bf16.msrb.mxu0 %v2781_v9  ;;  %1451 = vmatpush.bf16.msrb.mxu3 %v2617_v61  ;;  %v2401_v9 = vor.u32 %v3216_v3, %v2398_v4  ;;  %v3346_v61 = vld [vmem:[#allocation7 + $0x58c] sm:$0xf0]  ;;  %v2500_v4 = vld [vmem:[#allocation7 + $0x248] sm:$0xf]  ;;  %v3337_v48 = vld [vmem:[#allocation7 + $0x54c] sm:$0xf] }
  0x56   :  { %v2909_v3 = vor.u32 %v3346_v61, %v2908_v60  ;;  %v2788_v60 = vld [vmem:[#allocation7 + $0x488] sm:$0xf]  ;;  %v3316_v61 = vld [vmem:[#allocation7 + $0x49c] sm:$0xf0]  ;;  %v2886_v49 = vld [vmem:[#allocation7 + $0x560] sm:$0xf0] }
  0x57   :  { %1426 = vmatpush.bf16.msrb.mxu1 %v2209_v5  ;;  %v3244_v5 = vld [vmem:[#allocation7 + $0x25c] sm:$0xf0] }
  0x58   :  { %1439 = vmatpush.bf16.msrb.mxu2 %v2401_v9  ;;  %v3340_v9 = vld [vmem:[#allocation7 + $0x55c] sm:$0xf0]  ;;  %v2501_v11 = vor.u32 %v3244_v5, %v2500_v4  ;;  %v2766_v5 = vld [vmem:[#allocation7 + $0x470] sm:$0xf0] }
  0x59   :  { %1458 = vmatpush.bf16.msra.mxu0 %v2953_v10  ;;  %v2593_v10 = vor.u32 %v3264_v6, %v2590_v7  ;;  %v2692_v6 = vld [vmem:[#allocation7 + $0x3c8] sm:$0xf]  ;;  %v3292_v7 = vld [vmem:[#allocation7 + $0x3dc] sm:$0xf0]  ;;  %v2885_v15 = vor.u32 %v3340_v9, %v2884_v8  ;;  %v2597_v8 = vor.u32 %v3268_v59, %v2596_v58  ;;  %v2789_v9 = vor.u32 %v3316_v61, %v2788_v60  ;;  %v3283_v58 = vld [vmem:[#allocation7 + $0x39c] sm:$0xf] }
  0x5a   :  { %v2693_v14 = vor.u32 %v3292_v7, %v2692_v6  ;;  %v3355_v6 = vld [vmem:[#allocation7 + $0x5dc] sm:$0xf]  ;;  %v2958_v7 = vld [vmem:[#allocation7 + $0x5f0] sm:$0xf0] }
  0x5b   :  { %1452 = vmatpush.bf16.msrb.mxu3 %v2593_v10  ;;  %v2670_v59 = vld [vmem:[#allocation7 + $0x3b0] sm:$0xf0]  ;;  %v3331_v60 = vld [vmem:[#allocation7 + $0x51c] sm:$0xf] }
  0x5c   :  { %v2862_v61 = vld [vmem:[#allocation7 + $0x530] sm:$0xf0] }
  0x5d   :  { %1459 = vmatpush.bf16.msra.mxu0 %v2929_v13  ;;  %v3419_v13 = vld [vmem:[%s3697_s2] ss:$0 sm:$0xff] }
  0x61   :  { %1460 = vmatpush.bf16.msra.mxu0 %v2905_v16 }
  0x65   :  { %1461 = vmatpush.bf16.msra.mxu0 %v2881_v28  ;;  %v2956_v28 = vld [vmem:[#allocation7 + $0x5d8] sm:$0xf] }
  0x66   :  { %v2957_v43 = vor.u32 %v3358_v29, %v2956_v28  ;;  %v2452_v28 = vld [vmem:[#allocation7 + $0x1e8] sm:$0xf]  ;;  %v3232_v29 = vld [vmem:[#allocation7 + $0x1fc] sm:$0xf0] }
  0x69   :  { %1462 = vmatpush.bf16.msra.mxu0 %v2857_v40 }
  0x6d   :  { %1463 = vmatpush.bf16.msra.mxu0 %v2833_v52  ;;  %v2332_v52 = vld [vmem:[#allocation7 + $0xf8] sm:$0xf] }
  0x6e   :  { %v2333_v62 = vor.u32 %v3202_v53, %v2332_v52  ;;  %v2429_v52 = vor.u32 %v3226_v45, %v2428_v44  ;;  %v3172_v53 = vld [vmem:[#allocation7 + $0x1c] sm:$0xf0]  ;;  %v3241_v44 = vld [vmem:[#allocation7 + $0x24c] sm:$0xf]  ;;  %v2502_v45 = vld [vmem:[#allocation7 + $0x260] sm:$0xf0] }
  0x71   :  { %1464 = vmatpush.bf16.msra.mxu0 %v2809_v1  ;;  %v3196_v1 = vld [vmem:[#allocation7 + $0xdc] sm:$0xf0] }
  0x72   :  { %v2309_v10 = vor.u32 %v3196_v1, %v2308_v0  ;;  %v3259_v0 = vld [vmem:[#allocation7 + $0x2dc] sm:$0xf]  ;;  %v2574_v1 = vld [vmem:[#allocation7 + $0x2f0] sm:$0xf0] }
  0x75   :  { %1465 = vmatpush.bf16.msra.mxu0 %v2785_v12  ;;  %v2284_v12 = vld [vmem:[#allocation7 + $0x98] sm:$0xf] }
  0xb5   :  { %v178_v16 = vpop.f32.mrf.mxu0 }
  0xb6   :  { %v179_v17 = vadd.f32 %v3419_v13, %v178_v16  ;;  %v3190_v13 = vld [vmem:[#allocation7 + $0xac] sm:$0xf0]  ;;  %v2476_v16 = vld [vmem:[#allocation7 + $0x218] sm:$0xf] }
  0xb7   :  { %v2285_v22 = vor.u32 %v3190_v13, %v2284_v12  ;;  %v3205_v12 = vld [vmem:[#allocation7 + $0x12c] sm:$0xf]  ;;  %v2358_v13 = vld [vmem:[#allocation7 + $0x140] sm:$0xf0] }
  0xb8   :  { %v182_v19 = vmax.f32 %v179_v17, 0.0  ;;  %v3238_v17 = vld [vmem:[#allocation7 + $0x22c] sm:$0xf0] }
  0xb9   :  { %v2477_v23 = vor.u32 %v3238_v17, %v2476_v16  ;;  %v3253_v16 = vld [vmem:[#allocation7 + $0x2ac] sm:$0xf]  ;;  %v2550_v17 = vld [vmem:[#allocation7 + $0x2c0] sm:$0xf0] }
  0xba   :  { %v186_v20 = vperm.slane %v182_v19, %v185_v18  ;;  %v2668_v18 = vld [vmem:[#allocation7 + $0x398] sm:$0xf]  ;;  %v3286_v19 = vld [vmem:[#allocation7 + $0x3ac] sm:$0xf0] }
  0xbb   :  { %v2669_v26 = vor.u32 %v3286_v19, %v2668_v18  ;;  %v3301_v18 = vld [vmem:[#allocation7 + $0x42c] sm:$0xf]  ;;  %v2742_v19 = vld [vmem:[#allocation7 + $0x440] sm:$0xf0] }
  0xbc   :  { %188 = vst [vmem:[#allocation1] ss:$4 sm:$0xff] %v186_v20  ;;  %v2860_v20 = vld [vmem:[#allocation7 + $0x518] sm:$0xf] }
  0xbd   :  { %v180_v21 = vpop.f32.mrf.mxu0 }
  0xbe   :  { %v3334_v21 = vld [vmem:[#allocation7 + $0x52c] sm:$0xf0] }
  0xbf   :  { %v2861_v27 = vor.u32 %v3334_v21, %v2860_v20  ;;  %v3349_v20 = vld [vmem:[#allocation7 + $0x5ac] sm:$0xf]  ;;  %v2934_v21 = vld [vmem:[#allocation7 + $0x5c0] sm:$0xf0] }
  0xc3   :  { %v189_v30 = vld.sshfl [vmem:[#allocation1] sm:$0xff pattern:$0x73625140]  ;;  %v190_v31 = vld.sshfl [vmem:[#allocation1 + $0x8] sm:$0xff pattern:$0x73625140] }
  0xc4   :  { %v3649_v34 = vpack.c.bf16 %v189_v30, %v189_v30  ;;  %v3651_v35 = vpack.c.bf16 %v190_v31, %v190_v31  ;;  %v191_v36 = vld.sshfl [vmem:[#allocation1 + $0x10] sm:$0xff pattern:$0x73625140]  ;;  %v192_v37 = vld.sshfl [vmem:[#allocation1 + $0x18] sm:$0xff pattern:$0x73625140] }
  0xc5   :  { %v3653_v40 = vpack.c.bf16 %v191_v36, %v191_v36  ;;  %v3655_v41 = vpack.c.bf16 %v192_v37, %v192_v37  ;;  %v2644_v30 = vld [vmem:[#allocation7 + $0x368] sm:$0xf]  ;;  %v3280_v31 = vld [vmem:[#allocation7 + $0x37c] sm:$0xf0]  ;;  %v2261_v36 = vor.u32 %v3184_v25, %v2260_v24  ;;  %v2453_v37 = vor.u32 %v3232_v29, %v2452_v28  ;;  %v3199_v24 = vld [vmem:[#allocation7 + $0xfc] sm:$0xf] }
  0xc6   :  { %1375 = vmatmul.bf16.vlgmr.msra.gmra.mxu1 %v3649_v34  ;;  %1388 = vmatmul.bf16.vlgmr.msra.gmra.mxu2 %v3651_v35  ;;  %v2334_v25 = vld [vmem:[#allocation7 + $0x110] sm:$0xf0]  ;;  %v3247_v28 = vld [vmem:[#allocation7 + $0x27c] sm:$0xf] }
  0xc7   :  { %1401 = vmatmul.bf16.vlgmr.msra.gmra.mxu3 %v3653_v40  ;;  %1414 = vmatmul.bf16.vlgmr.msrb.gmra.mxu0 %v3655_v41  ;;  %v2526_v29 = vld [vmem:[#allocation7 + $0x290] sm:$0xf0] }
  0xc8   :  { %1471 = vmatpush.bf16.msra.mxu1 %v2381_v38  ;;  %1484 = vmatpush.bf16.msra.mxu2 %v2573_v39  ;;  %v2236_v38 = vld [vmem:[#allocation7 + $0x38] sm:$0xf]  ;;  %v3178_v39 = vld [vmem:[#allocation7 + $0x4c] sm:$0xf0] }
  0xc9   :  { %1497 = vmatpush.bf16.msra.mxu3 %v2765_v42  ;;  %1510 = vmatpush.bf16.msrb.mxu0 %v2957_v43  ;;  %v2645_v42 = vor.u32 %v3280_v31, %v2644_v30  ;;  %v2837_v43 = vor.u32 %v3328_v33, %v2836_v32  ;;  %v3295_v30 = vld [vmem:[#allocation7 + $0x3fc] sm:$0xf]  ;;  %v2718_v31 = vld [vmem:[#allocation7 + $0x410] sm:$0xf0] }
  0xca   :  { %v3343_v32 = vld [vmem:[#allocation7 + $0x57c] sm:$0xf]  ;;  %v2910_v33 = vld [vmem:[#allocation7 + $0x590] sm:$0xf0] }
  0xcc   :  { %1472 = vmatpush.bf16.msra.mxu1 %v2357_v50  ;;  %1485 = vmatpush.bf16.msra.mxu2 %v2549_v51  ;;  %v2212_v50 = vld [vmem:[#allocation7 + $0x8] sm:$0xf]  ;;  %v2237_v51 = vor.u32 %v3178_v39, %v2236_v38  ;;  %v3193_v38 = vld [vmem:[#allocation7 + $0xcc] sm:$0xf]  ;;  %v2310_v39 = vld [vmem:[#allocation7 + $0xe0] sm:$0xf0] }
  0xcd   :  { %1498 = vmatpush.bf16.msra.mxu3 %v2741_v54  ;;  %1511 = vmatpush.bf16.msrb.mxu0 %v2933_v55  ;;  %v2404_v54 = vld [vmem:[#allocation7 + $0x188] sm:$0xf]  ;;  %v3220_v55 = vld [vmem:[#allocation7 + $0x19c] sm:$0xf0] }
  0xce   :  { %v2405_v4 = vor.u32 %v3220_v55, %v2404_v54  ;;  %v2697_v54 = vor.u32 %v3289_v46, %v2694_v47  ;;  %v2889_v55 = vor.u32 %v3337_v48, %v2886_v49  ;;  %v2964_v46 = vld [vmem:[#allocation7 + $0x5e0] sm:$0xf]  ;;  %v3359_v47 = vld [vmem:[#allocation7 + $0x5f4] sm:$0xf0] }
  0xd0   :  { %1473 = vmatpush.bf16.msra.mxu1 %v2333_v62  ;;  %1486 = vmatpush.bf16.msra.mxu2 %v2525_v63  ;;  %v3211_v62 = vld [vmem:[#allocation7 + $0x15c] sm:$0xf]  ;;  %v2382_v63 = vld [vmem:[#allocation7 + $0x170] sm:$0xf0] }
  0xd1   :  { %1499 = vmatpush.bf16.msra.mxu3 %v2717_v2  ;;  %1512 = vmatpush.bf16.msrb.mxu0 %v2909_v3  ;;  %v3307_v2 = vld [vmem:[#allocation7 + $0x45c] sm:$0xf]  ;;  %v2213_v3 = vor.u32 %v3172_v53, %v2212_v50  ;;  %v2313_v50 = vor.u32 %v3193_v38, %v2310_v39  ;;  %v2286_v53 = vld [vmem:[#allocation7 + $0xb0] sm:$0xf0]  ;;  %v2580_v38 = vld [vmem:[#allocation7 + $0x2e0] sm:$0xf] }
  0xd2   :  { %v3263_v39 = vld [vmem:[#allocation7 + $0x2f4] sm:$0xf0] }
  0xd4   :  { %1474 = vmatpush.bf16.msra.mxu1 %v2309_v10  ;;  %1487 = vmatpush.bf16.msra.mxu2 %v2501_v11  ;;  %v2385_v10 = vor.u32 %v3211_v62, %v2382_v63  ;;  %v2577_v11 = vor.u32 %v3259_v0, %v2574_v1  ;;  %v3181_v0 = vld [vmem:[#allocation7 + $0x6c] sm:$0xf]  ;;  %v2262_v1 = vld [vmem:[#allocation7 + $0x80] sm:$0xf0] }
  0xd5   :  { %1500 = vmatpush.bf16.msra.mxu3 %v2693_v14  ;;  %1513 = vmatpush.bf16.msrb.mxu0 %v2885_v15  ;;  %v2769_v14 = vor.u32 %v3307_v2, %v2766_v5  ;;  %v2961_v15 = vor.u32 %v3355_v6, %v2958_v7  ;;  %v2673_v2 = vor.u32 %v3283_v58, %v2670_v59  ;;  %v2454_v5 = vld [vmem:[#allocation7 + $0x200] sm:$0xf0]  ;;  %v3277_v6 = vld [vmem:[#allocation7 + $0x36c] sm:$0xf]  ;;  %v2748_v58 = vld [vmem:[#allocation7 + $0x430] sm:$0xf] }
  0xd6   :  { %1427 = vmatmul.bf16.vlgmr.msrb.gmra.mxu1 %v3649_v34  ;;  %1440 = vmatmul.bf16.vlgmr.msrb.gmra.mxu2 %v3651_v35  ;;  %v2646_v7 = vld [vmem:[#allocation7 + $0x380] sm:$0xf0]  ;;  %v3305_v59 = vld [vmem:[#allocation7 + $0x444] sm:$0xf0] }
  0xd7   :  { %1453 = vmatmul.bf16.vlgmr.msrb.gmra.mxu3 %v3653_v40  ;;  %1466 = vmatmul.bf16.vlgmr.msra.gmra.mxu0 %v3655_v41 }
  0xd8   :  { %1475 = vmatpush.bf16.msra.mxu1 %v2285_v22  ;;  %1488 = vmatpush.bf16.msra.mxu2 %v2477_v23  ;;  %v2361_v22 = vor.u32 %v3205_v12, %v2358_v13  ;;  %v2553_v23 = vor.u32 %v3253_v16, %v2550_v17  ;;  %v3175_v12 = vld [vmem:[#allocation7 + $0x3c] sm:$0xf]  ;;  %v2238_v13 = vld [vmem:[#allocation7 + $0x50] sm:$0xf0] }
  0xd9   :  { %1501 = vmatpush.bf16.msra.mxu3 %v2669_v26  ;;  %1514 = vmatpush.bf16.msrb.mxu0 %v2861_v27  ;;  %v2745_v26 = vor.u32 %v3301_v18, %v2742_v19  ;;  %v2937_v27 = vor.u32 %v3349_v20, %v2934_v21  ;;  %v3223_v16 = vld [vmem:[#allocation7 + $0x1bc] sm:$0xf]  ;;  %v2430_v17 = vld [vmem:[#allocation7 + $0x1d0] sm:$0xf0] }
  0xda   :  { %v3271_v18 = vld [vmem:[#allocation7 + $0x33c] sm:$0xf]  ;;  %v2622_v19 = vld [vmem:[#allocation7 + $0x350] sm:$0xf0] }
  0xdb   :  { %v3319_v20 = vld [vmem:[#allocation7 + $0x4bc] sm:$0xf]  ;;  %v2814_v21 = vld [vmem:[#allocation7 + $0x4d0] sm:$0xf0] }
  0xdc   :  { %1476 = vmatpush.bf16.msra.mxu1 %v2261_v36  ;;  %1489 = vmatpush.bf16.msra.mxu2 %v2453_v37  ;;  %v2337_v36 = vor.u32 %v3199_v24, %v2334_v25  ;;  %v2529_v37 = vor.u32 %v3247_v28, %v2526_v29  ;;  %v2433_v24 = vor.u32 %v3223_v16, %v2430_v17  ;;  %v2214_v25 = vld [vmem:[#allocation7 + $0x20] sm:$0xf0]  ;;  %v2508_v16 = vld [vmem:[#allocation7 + $0x250] sm:$0xf]  ;;  %v3245_v17 = vld [vmem:[#allocation7 + $0x264] sm:$0xf0] }
  0xdd   :  { %1502 = vmatpush.bf16.msra.mxu3 %v2645_v42  ;;  %1515 = vmatpush.bf16.msrb.mxu0 %v2837_v43  ;;  %v2721_v42 = vor.u32 %v3295_v30, %v2718_v31  ;;  %v2913_v43 = vor.u32 %v3343_v32, %v2910_v33  ;;  %v2625_v28 = vor.u32 %v3271_v18, %v2622_v19  ;;  %v3265_v30 = vld [vmem:[#allocation7 + $0x30c] sm:$0xf]  ;;  %v2598_v31 = vld [vmem:[#allocation7 + $0x320] sm:$0xf0]  ;;  %v2700_v18 = vld [vmem:[#allocation7 + $0x3d0] sm:$0xf] }
  0xde   :  { %v2817_v29 = vor.u32 %v3319_v20, %v2814_v21  ;;  %v3313_v32 = vld [vmem:[#allocation7 + $0x48c] sm:$0xf]  ;;  %v2790_v33 = vld [vmem:[#allocation7 + $0x4a0] sm:$0xf0]  ;;  %v2601_v48 = vor.u32 %v3265_v30, %v2598_v31  ;;  %v3293_v19 = vld [vmem:[#allocation7 + $0x3e4] sm:$0xf0] }
  0xdf   :  { %v2793_v49 = vor.u32 %v3313_v32, %v2790_v33  ;;  %v2892_v20 = vld [vmem:[#allocation7 + $0x550] sm:$0xf]  ;;  %v3341_v21 = vld [vmem:[#allocation7 + $0x564] sm:$0xf0]  ;;  %v2676_v30 = vld [vmem:[#allocation7 + $0x3a0] sm:$0xf] }
  0xe0   :  { %1477 = vmatpush.bf16.msra.mxu1 %v2237_v51  ;;  %1490 = vmatpush.bf16.msra.mxu2 %v2429_v52  ;;  %v2505_v51 = vor.u32 %v3241_v44, %v2502_v45  ;;  %v3187_v52 = vld [vmem:[#allocation7 + $0x9c] sm:$0xf]  ;;  %v3311_v45 = vld [vmem:[#allocation7 + $0x474] sm:$0xf0]  ;;  %v2868_v32 = vld [vmem:[#allocation7 + $0x520] sm:$0xf] }
  0xe1   :  { %1503 = vmatpush.bf16.msra.mxu3 %v2621_v56  ;;  %1516 = vmatpush.bf16.msrb.mxu0 %v2813_v57  ;;  %v3235_v56 = vld [vmem:[#allocation7 + $0x21c] sm:$0xf]  ;;  %v2478_v57 = vld [vmem:[#allocation7 + $0x230] sm:$0xf0]  ;;  %v2289_v62 = vor.u32 %v3187_v52, %v2286_v53  ;;  %v2364_v52 = vld [vmem:[#allocation7 + $0x130] sm:$0xf] }
  0xe2   :  { %v2481_v63 = vor.u32 %v3235_v56, %v2478_v57  ;;  %v3209_v53 = vld [vmem:[#allocation7 + $0x144] sm:$0xf0]  ;;  %v2556_v56 = vld [vmem:[#allocation7 + $0x2b0] sm:$0xf]  ;;  %v3287_v31 = vld [vmem:[#allocation7 + $0x3b4] sm:$0xf0] }
  0xe3   :  { %v3257_v57 = vld [vmem:[#allocation7 + $0x2c4] sm:$0xf0]  ;;  %v3335_v33 = vld [vmem:[#allocation7 + $0x534] sm:$0xf0] }
  0xe4   :  { %1478 = vmatpush.bf16.msra.mxu1 %v2213_v3  ;;  %1491 = vmatpush.bf16.msra.mxu2 %v2405_v4  ;;  %v2865_v3 = vor.u32 %v3331_v60, %v2862_v61  ;;  %v3229_v4 = vld [vmem:[#allocation7 + $0x1ec] sm:$0xf]  ;;  %v2940_v60 = vld [vmem:[#allocation7 + $0x5b0] sm:$0xf]  ;;  %v3353_v61 = vld [vmem:[#allocation7 + $0x5c4] sm:$0xf0] }
  0xe5   :  { %1504 = vmatpush.bf16.msra.mxu3 %v2597_v8  ;;  %1517 = vmatpush.bf16.msrb.mxu0 %v2789_v9  ;;  %v3325_v8 = vld [vmem:[#allocation7 + $0x4ec] sm:$0xf]  ;;  %v2838_v9 = vld [vmem:[#allocation7 + $0x500] sm:$0xf0] }
  0xe7   :  { %1479 = vmatmul.bf16.vlgmr.msra.gmra.mxu1 %v3649_v34  ;;  %1492 = vmatmul.bf16.vlgmr.msra.gmra.mxu2 %v3651_v35 }
  0xe8   :  { %1523 = vmatpush.bf16.msrb.mxu1 %v2385_v10  ;;  %1536 = vmatpush.bf16.msrb.mxu2 %v2577_v11  ;;  %v2265_v10 = vor.u32 %v3181_v0, %v2262_v1  ;;  %v2457_v11 = vor.u32 %v3229_v4, %v2454_v5  ;;  %v2340_v0 = vld [vmem:[#allocation7 + $0x100] sm:$0xf]  ;;  %v3203_v1 = vld [vmem:[#allocation7 + $0x114] sm:$0xf0] }
  0xe9   :  { %1549 = vmatpush.bf16.msrb.mxu3 %v2769_v14  ;;  %1562 = vmatpush.bf16.msra.mxu0 %v2961_v15  ;;  %v2649_v14 = vor.u32 %v3277_v6, %v2646_v7  ;;  %v2841_v15 = vor.u32 %v3325_v8, %v2838_v9  ;;  %v2532_v4 = vld [vmem:[#allocation7 + $0x280] sm:$0xf]  ;;  %v3251_v5 = vld [vmem:[#allocation7 + $0x294] sm:$0xf0] }
  0xea   :  { %1505 = vmatmul.bf16.vlgmr.msra.gmra.mxu3 %v3653_v40  ;;  %1518 = vmatmul.bf16.vlgmr.msrb.gmra.mxu0 %v3655_v41  ;;  %v2724_v6 = vld [vmem:[#allocation7 + $0x400] sm:$0xf]  ;;  %v3299_v7 = vld [vmem:[#allocation7 + $0x414] sm:$0xf0] }
  0xeb   :  { %v2916_v8 = vld [vmem:[#allocation7 + $0x580] sm:$0xf]  ;;  %v3347_v9 = vld [vmem:[#allocation7 + $0x594] sm:$0xf0] }
  0xec   :  { %1524 = vmatpush.bf16.msrb.mxu1 %v2361_v22  ;;  %1537 = vmatpush.bf16.msrb.mxu2 %v2553_v23  ;;  %v3169_v22 = vld [vmem:[#allocation7 + $0xc] sm:$0xf]  ;;  %v2241_v23 = vor.u32 %v3175_v12, %v2238_v13  ;;  %v2316_v12 = vld [vmem:[#allocation7 + $0xd0] sm:$0xf]  ;;  %v3197_v13 = vld [vmem:[#allocation7 + $0xe4] sm:$0xf0] }
  0xed   :  { %1550 = vmatpush.bf16.msrb.mxu3 %v2745_v26  ;;  %1563 = vmatpush.bf16.msra.mxu0 %v2937_v27  ;;  %v3217_v26 = vld [vmem:[#allocation7 + $0x18c] sm:$0xf]  ;;  %v2406_v27 = vld [vmem:[#allocation7 + $0x1a0] sm:$0xf0] }
  0xee   :  { %v2409_v44 = vor.u32 %v3217_v26, %v2406_v27  ;;  %v2701_v26 = vor.u32 %v3293_v19, %v2700_v18  ;;  %v2893_v27 = vor.u32 %v3341_v21, %v2892_v20  ;;  %v3356_v18 = vld [vmem:[#allocation7 + $0x5e4] sm:$0xf]  ;;  %v2966_v19 = vld [vmem:[#allocation7 + $0x5f8] sm:$0xf0] }
  0xf0   :  { %1525 = vmatpush.bf16.msrb.mxu1 %v2337_v36  ;;  %1538 = vmatpush.bf16.msrb.mxu2 %v2529_v37  ;;  %v2388_v36 = vld [vmem:[#allocation7 + $0x160] sm:$0xf]  ;;  %v3215_v37 = vld [vmem:[#allocation7 + $0x174] sm:$0xf0] }
  0xf1   :  { %1551 = vmatpush.bf16.msrb.mxu3 %v2721_v42  ;;  %1564 = vmatpush.bf16.msra.mxu0 %v2913_v43  ;;  %v2772_v42 = vld [vmem:[#allocation7 + $0x460] sm:$0xf]  ;;  %v2217_v43 = vor.u32 %v3169_v22, %v2214_v25  ;;  %v2317_v22 = vor.u32 %v3197_v13, %v2316_v12  ;;  %v3191_v25 = vld [vmem:[#allocation7 + $0xb4] sm:$0xf0]  ;;  %v3260_v12 = vld [vmem:[#allocation7 + $0x2e4] sm:$0xf] }
  0xf2   :  { %v2582_v13 = vld [vmem:[#allocation7 + $0x2f8] sm:$0xf0] }
  0xf4   :  { %1526 = vmatpush.bf16.msrb.mxu1 %v2313_v50  ;;  %1539 = vmatpush.bf16.msrb.mxu2 %v2505_v51  ;;  %v2389_v50 = vor.u32 %v3215_v37, %v2388_v36  ;;  %v2581_v51 = vor.u32 %v3263_v39, %v2580_v38  ;;  %v2268_v38 = vld [vmem:[#allocation7 + $0x70] sm:$0xf]  ;;  %v3185_v39 = vld [vmem:[#allocation7 + $0x84] sm:$0xf0] }
  0xf5   :  { %1552 = vmatpush.bf16.msrb.mxu3 %v2697_v54  ;;  %1565 = vmatpush.bf16.msra.mxu0 %v2889_v55  ;;  %v2773_v54 = vor.u32 %v3311_v45, %v2772_v42  ;;  %v2965_v55 = vor.u32 %v3359_v47, %v2964_v46  ;;  %v2677_v42 = vor.u32 %v3287_v31, %v2676_v30  ;;  %v3233_v45 = vld [vmem:[#allocation7 + $0x204] sm:$0xf0]  ;;  %v2652_v46 = vld [vmem:[#allocation7 + $0x370] sm:$0xf]  ;;  %v3302_v30 = vld [vmem:[#allocation7 + $0x434] sm:$0xf] }
  0xf6   :  { %v3281_v47 = vld [vmem:[#allocation7 + $0x384] sm:$0xf0]  ;;  %v2750_v31 = vld [vmem:[#allocation7 + $0x448] sm:$0xf0] }
  0xf8   :  { %1527 = vmatpush.bf16.msrb.mxu1 %v2289_v62  ;;  %1540 = vmatpush.bf16.msrb.mxu2 %v2481_v63  ;;  %v2365_v62 = vor.u32 %v3209_v53, %v2364_v52  ;;  %v2557_v63 = vor.u32 %v3257_v57, %v2556_v56  ;;  %v2244_v52 = vld [vmem:[#allocation7 + $0x40] sm:$0xf]  ;;  %v3179_v53 = vld [vmem:[#allocation7 + $0x54] sm:$0xf0] }
  0xf9   :  { %1553 = vmatpush.bf16.msrb.mxu3 %v2673_v2  ;;  %1566 = vmatpush.bf16.msra.mxu0 %v2865_v3  ;;  %v2749_v2 = vor.u32 %v3305_v59, %v2748_v58  ;;  %v2941_v3 = vor.u32 %v3353_v61, %v2940_v60  ;;  %v2436_v56 = vld [vmem:[#allocation7 + $0x1c0] sm:$0xf]  ;;  %v3227_v57 = vld [vmem:[#allocation7 + $0x1d4] sm:$0xf0] }
  0xfa   :  { %v2628_v58 = vld [vmem:[#allocation7 + $0x340] sm:$0xf]  ;;  %v3275_v59 = vld [vmem:[#allocation7 + $0x354] sm:$0xf0] }
  0xfb   :  { %v2820_v60 = vld [vmem:[#allocation7 + $0x4c0] sm:$0xf]  ;;  %v3323_v61 = vld [vmem:[#allocation7 + $0x4d4] sm:$0xf0] }
  0xfc   :  { %1528 = vmatpush.bf16.msrb.mxu1 %v2265_v10  ;;  %1541 = vmatpush.bf16.msrb.mxu2 %v2457_v11  ;;  %v2341_v10 = vor.u32 %v3203_v1, %v2340_v0  ;;  %v2533_v11 = vor.u32 %v3251_v5, %v2532_v4  ;;  %v2437_v0 = vor.u32 %v3227_v57, %v2436_v56  ;;  %v3173_v1 = vld [vmem:[#allocation7 + $0x24] sm:$0xf0]  ;;  %v3242_v56 = vld [vmem:[#allocation7 + $0x254] sm:$0xf]  ;;  %v2510_v57 = vld [vmem:[#allocation7 + $0x268] sm:$0xf0] }
  0xfd   :  { %1554 = vmatpush.bf16.msrb.mxu3 %v2649_v14  ;;  %1567 = vmatpush.bf16.msra.mxu0 %v2841_v15  ;;  %v2725_v14 = vor.u32 %v3299_v7, %v2724_v6  ;;  %v2917_v15 = vor.u32 %v3347_v9, %v2916_v8  ;;  %v2629_v4 = vor.u32 %v3275_v59, %v2628_v58  ;;  %v2604_v6 = vld [vmem:[#allocation7 + $0x310] sm:$0xf]  ;;  %v3269_v7 = vld [vmem:[#allocation7 + $0x324] sm:$0xf0]  ;;  %v3290_v58 = vld [vmem:[#allocation7 + $0x3d4] sm:$0xf] }
  0xfe   :  { %v2821_v5 = vor.u32 %v3323_v61, %v2820_v60  ;;  %v2796_v8 = vld [vmem:[#allocation7 + $0x490] sm:$0xf]  ;;  %v3317_v9 = vld [vmem:[#allocation7 + $0x4a4] sm:$0xf0]  ;;  %v2605_v20 = vor.u32 %v3269_v7, %v2604_v6  ;;  %v2702_v59 = vld [vmem:[#allocation7 + $0x3e8] sm:$0xf0] }
  0xff   :  { %v2797_v21 = vor.u32 %v3317_v9, %v2796_v8  ;;  %v3338_v60 = vld [vmem:[#allocation7 + $0x554] sm:$0xf]  ;;  %v2894_v61 = vld [vmem:[#allocation7 + $0x568] sm:$0xf0]  ;;  %v3284_v6 = vld [vmem:[#allocation7 + $0x3a4] sm:$0xf] }
 0x100   :  { %1529 = vmatpush.bf16.msrb.mxu1 %v2241_v23  ;;  %1542 = vmatpush.bf16.msrb.mxu2 %v2433_v24  ;;  %v2509_v23 = vor.u32 %v3245_v17, %v2508_v16  ;;  %v2292_v24 = vld [vmem:[#allocation7 + $0xa0] sm:$0xf]  ;;  %v2774_v17 = vld [vmem:[#allocation7 + $0x478] sm:$0xf0]  ;;  %v3332_v8 = vld [vmem:[#allocation7 + $0x524] sm:$0xf] }
 0x101   :  { %1555 = vmatpush.bf16.msrb.mxu3 %v2625_v28  ;;  %1568 = vmatpush.bf16.msra.mxu0 %v2817_v29  ;;  %v2484_v28 = vld [vmem:[#allocation7 + $0x220] sm:$0xf]  ;;  %v3239_v29 = vld [vmem:[#allocation7 + $0x234] sm:$0xf0]  ;;  %v2293_v36 = vor.u32 %v3191_v25, %v2292_v24  ;;  %v3206_v24 = vld [vmem:[#allocation7 + $0x134] sm:$0xf] }
 0x102   :  { %v2485_v37 = vor.u32 %v3239_v29, %v2484_v28  ;;  %v2366_v25 = vld [vmem:[#allocation7 + $0x148] sm:$0xf0]  ;;  %v3254_v28 = vld [vmem:[#allocation7 + $0x2b4] sm:$0xf]  ;;  %v2678_v7 = vld [vmem:[#allocation7 + $0x3b8] sm:$0xf0] }
 0x103   :  { %v2558_v29 = vld [vmem:[#allocation7 + $0x2c8] sm:$0xf0]  ;;  %v2870_v9 = vld [vmem:[#allocation7 + $0x538] sm:$0xf0] }
 0x104   :  { %1530 = vmatpush.bf16.msrb.mxu1 %v2217_v43  ;;  %1543 = vmatpush.bf16.msrb.mxu2 %v2409_v44  ;;  %v2869_v43 = vor.u32 %v3335_v33, %v2868_v32  ;;  %v2460_v44 = vld [vmem:[#allocation7 + $0x1f0] sm:$0xf]  ;;  %v3350_v32 = vld [vmem:[#allocation7 + $0x5b4] sm:$0xf]  ;;  %v2942_v33 = vld [vmem:[#allocation7 + $0x5c8] sm:$0xf0] }
 0x105   :  { %1556 = vmatpush.bf16.msrb.mxu3 %v2601_v48  ;;  %1569 = vmatpush.bf16.msra.mxu0 %v2793_v49  ;;  %v2844_v48 = vld [vmem:[#allocation7 + $0x4f0] sm:$0xf]  ;;  %v3329_v49 = vld [vmem:[#allocation7 + $0x504] sm:$0xf0] }
 0x107   :  { %1531 = vmatmul.bf16.vlgmr.msrb.gmra.mxu1 %v3649_v34  ;;  %1544 = vmatmul.bf16.vlgmr.msrb.gmra.mxu2 %v3651_v35 }
 0x108   :  { %1575 = vmatpush.bf16.msra.mxu1 %v2389_v50  ;;  %1588 = vmatpush.bf16.msra.mxu2 %v2581_v51  ;;  %v2269_v50 = vor.u32 %v3185_v39, %v2268_v38  ;;  %v2461_v51 = vor.u32 %v3233_v45, %v2460_v44  ;;  %v3200_v38 = vld [vmem:[#allocation7 + $0x104] sm:$0xf]  ;;  %v2342_v39 = vld [vmem:[#allocation7 + $0x118] sm:$0xf0] }
 0x109   :  { %1601 = vmatpush.bf16.msra.mxu3 %v2773_v54  ;;  %1614 = vmatpush.bf16.msrb.mxu0 %v2965_v55  ;;  %v2653_v54 = vor.u32 %v3281_v47, %v2652_v46  ;;  %v2845_v55 = vor.u32 %v3329_v49, %v2844_v48  ;;  %v3248_v44 = vld [vmem:[#allocation7 + $0x284] sm:$0xf]  ;;  %v2534_v45 = vld [vmem:[#allocation7 + $0x298] sm:$0xf0] }
 0x10a   :  { %1557 = vmatmul.bf16.vlgmr.msrb.gmra.mxu3 %v3653_v40  ;;  %1570 = vmatmul.bf16.vlgmr.msra.gmra.mxu0 %v3655_v41  ;;  %v3296_v46 = vld [vmem:[#allocation7 + $0x404] sm:$0xf]  ;;  %v2726_v47 = vld [vmem:[#allocation7 + $0x418] sm:$0xf0] }
 0x10b   :  { %v3344_v48 = vld [vmem:[#allocation7 + $0x584] sm:$0xf]  ;;  %v2918_v49 = vld [vmem:[#allocation7 + $0x598] sm:$0xf0] }
 0x10c   :  { %1576 = vmatpush.bf16.msra.mxu1 %v2365_v62  ;;  %1589 = vmatpush.bf16.msra.mxu2 %v2557_v63  ;;  %v2220_v62 = vld [vmem:[#allocation7 + $0x10] sm:$0xf]  ;;  %v2245_v63 = vor.u32 %v3179_v53, %v2244_v52  ;;  %v3194_v52 = vld [vmem:[#allocation7 + $0xd4] sm:$0xf]  ;;  %v2318_v53 = vld [vmem:[#allocation7 + $0xe8] sm:$0xf0] }
 0x10d   :  { %1602 = vmatpush.bf16.msra.mxu3 %v2749_v2  ;;  %1615 = vmatpush.bf16.msrb.mxu0 %v2941_v3  ;;  %v2412_v2 = vld [vmem:[#allocation7 + $0x190] sm:$0xf]  ;;  %v3221_v3 = vld [vmem:[#allocation7 + $0x1a4] sm:$0xf0] }
 0x10e   :  { %v2413_v16 = vor.u32 %v3221_v3, %v2412_v2  ;;  %v2705_v2 = vor.u32 %v3290_v58, %v2702_v59  ;;  %v2897_v3 = vor.u32 %v3338_v60, %v2894_v61  ;;  %v3374_v58 = vld [vmem:[#allocation10 + $0x70] sm:$0xff]  ;;  %v3365_v61 = vld [vmem:[#allocation10 + $0x28] sm:$0xff] }
 0x10f   :  { %v3382_v60 = vld [vmem:[#allocation10 + $0xb0] sm:$0xff] }
 0x110   :  { %1577 = vmatpush.bf16.msra.mxu1 %v2341_v10  ;;  %1590 = vmatpush.bf16.msra.mxu2 %v2533_v11  ;;  %v3212_v10 = vld [vmem:[#allocation7 + $0x164] sm:$0xf]  ;;  %v2390_v11 = vld [vmem:[#allocation7 + $0x178] sm:$0xf0] }
 0x111   :  { %1603 = vmatpush.bf16.msra.mxu3 %v2725_v14  ;;  %1616 = vmatpush.bf16.msrb.mxu0 %v2917_v15  ;;  %v3308_v14 = vld [vmem:[#allocation7 + $0x464] sm:$0xf]  ;;  %v2221_v15 = vor.u32 %v3173_v1, %v2220_v62  ;;  %v2321_v62 = vor.u32 %v3194_v52, %v2318_v53  ;;  %v2294_v1 = vld [vmem:[#allocation7 + $0xb8] sm:$0xf0] }
 0x114   :  { %1578 = vmatpush.bf16.msra.mxu1 %v2317_v22  ;;  %1591 = vmatpush.bf16.msra.mxu2 %v2509_v23  ;;  %v2393_v22 = vor.u32 %v3212_v10, %v2390_v11  ;;  %v2585_v23 = vor.u32 %v3260_v12, %v2582_v13  ;;  %v3182_v12 = vld [vmem:[#allocation7 + $0x74] sm:$0xf]  ;;  %v2270_v13 = vld [vmem:[#allocation7 + $0x88] sm:$0xf0] }
 0x115   :  { %1604 = vmatpush.bf16.msra.mxu3 %v2701_v26  ;;  %1617 = vmatpush.bf16.msrb.mxu0 %v2893_v27  ;;  %v2777_v26 = vor.u32 %v3308_v14, %v2774_v17  ;;  %v2969_v27 = vor.u32 %v3356_v18, %v2966_v19  ;;  %v2681_v14 = vor.u32 %v3284_v6, %v2678_v7  ;;  %v2462_v17 = vld [vmem:[#allocation7 + $0x208] sm:$0xf0]  ;;  %v3278_v18 = vld [vmem:[#allocation7 + $0x374] sm:$0xf]  ;;  %v3363_v6 = vld [vmem:[#allocation10 + $0x18] sm:$0xff] }
 0x116   :  { %v2654_v19 = vld [vmem:[#allocation7 + $0x388] sm:$0xf0] }
 0x118   :  { %1579 = vmatpush.bf16.msra.mxu1 %v2293_v36  ;;  %1592 = vmatpush.bf16.msra.mxu2 %v2485_v37  ;;  %v2369_v36 = vor.u32 %v3206_v24, %v2366_v25  ;;  %v2561_v37 = vor.u32 %v3254_v28, %v2558_v29  ;;  %v3176_v24 = vld [vmem:[#allocation7 + $0x44] sm:$0xf]  ;;  %v2246_v25 = vld [vmem:[#allocation7 + $0x58] sm:$0xf0] }
 0x119   :  { %1605 = vmatpush.bf16.msra.mxu3 %v2677_v42  ;;  %1618 = vmatpush.bf16.msrb.mxu0 %v2869_v43  ;;  %v2753_v42 = vor.u32 %v3302_v30, %v2750_v31  ;;  %v2945_v43 = vor.u32 %v3350_v32, %v2942_v33  ;;  %v3224_v28 = vld [vmem:[#allocation7 + $0x1c4] sm:$0xf]  ;;  %v2438_v29 = vld [vmem:[#allocation7 + $0x1d8] sm:$0xf0] }
 0x11a   :  { %v3272_v30 = vld [vmem:[#allocation7 + $0x344] sm:$0xf]  ;;  %v2630_v31 = vld [vmem:[#allocation7 + $0x358] sm:$0xf0] }
 0x11b   :  { %v3320_v32 = vld [vmem:[#allocation7 + $0x4c4] sm:$0xf]  ;;  %v2822_v33 = vld [vmem:[#allocation7 + $0x4d8] sm:$0xf0] }
 0x11c   :  { %1580 = vmatpush.bf16.msra.mxu1 %v2269_v50  ;;  %1593 = vmatpush.bf16.msra.mxu2 %v2461_v51  ;;  %v2345_v50 = vor.u32 %v3200_v38, %v2342_v39  ;;  %v2537_v51 = vor.u32 %v3248_v44, %v2534_v45  ;;  %v3170_v38 = vld [vmem:[#allocation7 + $0x14] sm:$0xf]  ;;  %v2222_v39 = vld [vmem:[#allocation7 + $0x28] sm:$0xf0] }
 0x11d   :  { %1606 = vmatpush.bf16.msra.mxu3 %v2653_v54  ;;  %1619 = vmatpush.bf16.msrb.mxu0 %v2845_v55  ;;  %v2729_v54 = vor.u32 %v3296_v46, %v2726_v47  ;;  %v2921_v55 = vor.u32 %v3344_v48, %v2918_v49  ;;  %v3218_v44 = vld [vmem:[#allocation7 + $0x194] sm:$0xf]  ;;  %v2414_v45 = vld [vmem:[#allocation7 + $0x1a8] sm:$0xf0] }
 0x11e   :  { %v3266_v46 = vld [vmem:[#allocation7 + $0x314] sm:$0xf]  ;;  %v2606_v47 = vld [vmem:[#allocation7 + $0x328] sm:$0xf0] }
 0x11f   :  { %v3314_v48 = vld [vmem:[#allocation7 + $0x494] sm:$0xf]  ;;  %v2798_v49 = vld [vmem:[#allocation7 + $0x4a8] sm:$0xf0]  ;;  %v2609_v52 = vor.u32 %v3266_v46, %v2606_v47 }
 0x120   :  { %1581 = vmatpush.bf16.msra.mxu1 %v2245_v63  ;;  %1594 = vmatpush.bf16.msra.mxu2 %v2437_v0  ;;  %v2513_v63 = vor.u32 %v3242_v56, %v2510_v57  ;;  %v3188_v0 = vld [vmem:[#allocation7 + $0xa4] sm:$0xf]  ;;  %v2801_v53 = vor.u32 %v3314_v48, %v2798_v49  ;;  %v3366_v57 = vld [vmem:[#allocation10 + $0x30] sm:$0xff] }
 0x121   :  { %1607 = vmatpush.bf16.msra.mxu3 %v2629_v4  ;;  %1620 = vmatpush.bf16.msrb.mxu0 %v2821_v5  ;;  %v3236_v4 = vld [vmem:[#allocation7 + $0x224] sm:$0xf]  ;;  %v2486_v5 = vld [vmem:[#allocation7 + $0x238] sm:$0xf0]  ;;  %v2297_v10 = vor.u32 %v3188_v0, %v2294_v1  ;;  %v3373_v0 = vld [vmem:[#allocation10 + $0x68] sm:$0xff] }
 0x122   :  { %v2489_v11 = vor.u32 %v3236_v4, %v2486_v5  ;;  %v3383_v56 = vld [vmem:[#allocation10 + $0xb8] sm:$0xff]  ;;  %v3380_v5 = vld [vmem:[#allocation10 + $0xa0] sm:$0xff] }
 0x123   :  { %v3387_v49 = vld [vmem:[#allocation10 + $0xd8] sm:$0xff] }
 0x124   :  { %1582 = vmatpush.bf16.msra.mxu1 %v2221_v15  ;;  %1595 = vmatpush.bf16.msra.mxu2 %v2413_v16  ;;  %v2873_v15 = vor.u32 %v3332_v8, %v2870_v9  ;;  %v3230_v16 = vld [vmem:[#allocation7 + $0x1f4] sm:$0xf]  ;;  %v3371_v8 = vld [vmem:[#allocation10 + $0x58] sm:$0xff] }
 0x125   :  { %1608 = vmatpush.bf16.msra.mxu3 %v2605_v20  ;;  %1621 = vmatpush.bf16.msrb.mxu0 %v2797_v21  ;;  %v3326_v20 = vld [vmem:[#allocation7 + $0x4f4] sm:$0xf]  ;;  %v2846_v21 = vld [vmem:[#allocation7 + $0x508] sm:$0xf0] }
 0x127   :  { %1583 = vmatmul.bf16.vlgmr.msra.gmra.mxu1 %v3649_v34  ;;  %1596 = vmatmul.bf16.vlgmr.msra.gmra.mxu2 %v3651_v35 }
 0x128   :  { %1627 = vmatpush.bf16.msrb.mxu1 %v2393_v22  ;;  %1640 = vmatpush.bf16.msrb.mxu2 %v2585_v23  ;;  %v2273_v22 = vor.u32 %v3182_v12, %v2270_v13  ;;  %v2465_v23 = vor.u32 %v3230_v16, %v2462_v17  ;;  %v3370_v12 = vld [vmem:[#allocation10 + $0x50] sm:$0xff] }
 0x129   :  { %1653 = vmatpush.bf16.msrb.mxu3 %v2777_v26  ;;  %1666 = vmatpush.bf16.msra.mxu0 %v2969_v27  ;;  %v2657_v26 = vor.u32 %v3278_v18, %v2654_v19  ;;  %v2849_v27 = vor.u32 %v3326_v20, %v2846_v21  ;;  %v3378_v17 = vld [vmem:[#allocation10 + $0x90] sm:$0xff]  ;;  %v3361_v18 = vld [vmem:[#allocation10 + $0x8] sm:$0xff] }
 0x12a   :  { %1609 = vmatmul.bf16.vlgmr.msra.gmra.mxu3 %v3653_v40  ;;  %1622 = vmatmul.bf16.vlgmr.msrb.gmra.mxu0 %v3655_v41  ;;  %v3369_v21 = vld [vmem:[#allocation10 + $0x48] sm:$0xff] }
 0x12c   :  { %1628 = vmatpush.bf16.msrb.mxu1 %v2369_v36  ;;  %1641 = vmatpush.bf16.msrb.mxu2 %v2561_v37  ;;  %v2249_v36 = vor.u32 %v3176_v24, %v2246_v25  ;;  %v2441_v37 = vor.u32 %v3224_v28, %v2438_v29  ;;  %v3390_v24 = vld [vmem:[#allocation10 + $0xf0] sm:$0xff]  ;;  %v3377_v25 = vld [vmem:[#allocation10 + $0x88] sm:$0xff]  ;;  %v3368_v28 = vld [vmem:[#allocation10 + $0x40] sm:$0xff] }
 0x12d   :  { %1654 = vmatpush.bf16.msrb.mxu3 %v2753_v42  ;;  %1667 = vmatpush.bf16.msra.mxu0 %v2945_v43  ;;  %v2633_v42 = vor.u32 %v3272_v30, %v2630_v31  ;;  %v2825_v43 = vor.u32 %v3320_v32, %v2822_v33  ;;  %v3389_v33 = vld [vmem:[#allocation10 + $0xe8] sm:$0xff] }
 0x130   :  { %1629 = vmatpush.bf16.msrb.mxu1 %v2345_v50  ;;  %1642 = vmatpush.bf16.msrb.mxu2 %v2537_v51  ;;  %v2225_v50 = vor.u32 %v3170_v38, %v2222_v39  ;;  %v2417_v51 = vor.u32 %v3218_v44, %v2414_v45  ;;  %v3388_v44 = vld [vmem:[#allocation10 + $0xe0] sm:$0xff] }
 0x131   :  { %1655 = vmatpush.bf16.msrb.mxu3 %v2729_v54  ;;  %1668 = vmatpush.bf16.msra.mxu0 %v2921_v55  ;;  %v3367_v54 = vld [vmem:[#allocation10 + $0x38] sm:$0xff] }
 0x132   :  { %v3375_v55 = vld [vmem:[#allocation10 + $0x78] sm:$0xff] }
 0x134   :  { %1630 = vmatpush.bf16.msrb.mxu1 %v2321_v62  ;;  %1643 = vmatpush.bf16.msrb.mxu2 %v2513_v63  ;;  %v3681_v62 = vld [vmem:[#allocation8] sm:$0x3f] }
 0x135   :  { %1656 = vmatpush.bf16.msrb.mxu3 %v2705_v2  ;;  %1669 = vmatpush.bf16.msra.mxu0 %v2897_v3  ;;  %v395_v1 = vperm.slane %v3681_v62, 0  ;;  %v396_v19 = vperm.slane %v3681_v62, 1 }
 0x138   :  { %1631 = vmatpush.bf16.msrb.mxu1 %v2297_v10  ;;  %1644 = vmatpush.bf16.msrb.mxu2 %v2489_v11  ;;  %v3379_v10 = vld [vmem:[#allocation10 + $0x98] sm:$0xff]  ;;  %v3362_v11 = vld [vmem:[#allocation10 + $0x10] sm:$0xff] }
 0x139   :  { %1657 = vmatpush.bf16.msrb.mxu3 %v2681_v14  ;;  %1670 = vmatpush.bf16.msra.mxu0 %v2873_v15 }
 0x13c   :  { %1632 = vmatpush.bf16.msrb.mxu1 %v2273_v22  ;;  %1645 = vmatpush.bf16.msrb.mxu2 %v2465_v23  ;;  %v3391_v22 = vld [vmem:[#allocation10 + $0xf8] sm:$0xff] }
 0x13d   :  { %1658 = vmatpush.bf16.msrb.mxu3 %v2657_v26  ;;  %1671 = vmatpush.bf16.msra.mxu0 %v2849_v27  ;;  %v3360_v27 = vld [vmem:[#allocation10] sm:$0xff] }
 0x140   :  { %1633 = vmatpush.bf16.msrb.mxu1 %v2249_v36  ;;  %1646 = vmatpush.bf16.msrb.mxu2 %v2441_v37  ;;  %v3376_v37 = vld [vmem:[#allocation10 + $0x80] sm:$0xff] }
 0x141   :  { %1659 = vmatpush.bf16.msrb.mxu3 %v2633_v42  ;;  %1672 = vmatpush.bf16.msra.mxu0 %v2825_v43 }
 0x143   :  { %v1376_v59 = vpop.f32.mrf.mxu1 }
 0x144   :  { %1634 = vmatpush.bf16.msrb.mxu1 %v2225_v50  ;;  %1647 = vmatpush.bf16.msrb.mxu2 %v2417_v51  ;;  %v1415_v63 = vpop.f32.mrf.mxu0  ;;  %v1377_v3 = vadd.f32 %v1376_v59, %v395_v1  ;;  %v397_v51 = vperm.slane %v3681_v62, 2  ;;  %v3385_v59 = vld [vmem:[#allocation10 + $0xc8] sm:$0xff] }
 0x145   :  { %1660 = vmatpush.bf16.msrb.mxu3 %v2609_v52  ;;  %1673 = vmatpush.bf16.msra.mxu0 %v2801_v53  ;;  %v3386_v53 = vld [vmem:[#allocation10 + $0xd0] sm:$0xff] }
 0x147   :  { %1635 = vmatmul.bf16.vlgmr.msrb.gmra.mxu1 %v3649_v34  ;;  %1648 = vmatmul.bf16.vlgmr.msrb.gmra.mxu2 %v3651_v35  ;;  %v3381_v34 = vld [vmem:[#allocation10 + $0xa8] sm:$0xff]  ;;  %v3364_v35 = vld [vmem:[#allocation10 + $0x20] sm:$0xff] }
 0x148   :  { %2079 = vmatpush.bf16.msra.mxu1 %v3367_v54  ;;  %2092 = vmatpush.bf16.msra.mxu2 %v3375_v55 }
 0x149   :  { %1661 = vmatmul.bf16.vlgmr.msrb.gmra.mxu3 %v3653_v40  ;;  %1674 = vmatmul.bf16.vlgmr.msra.gmra.mxu0 %v3655_v41  ;;  %v3372_v40 = vld [vmem:[#allocation10 + $0x60] sm:$0xff]  ;;  %v1389_v2 = vpop.f32.mrf.mxu2 }
 0x14a   :  { %2105 = vmatpush.bf16.msra.mxu3 %v3383_v56  ;;  %v1402_v41 = vpop.f32.mrf.mxu3  ;;  %v1390_v9 = vadd.f32 %v1389_v2, %v1377_v3  ;;  %2118 = vmatpush.bf16.msrb.mxu0 %v3391_v22  ;;  %v3397_v3 = vld [vmem:[#allocation10 + $0x128] sm:$0xff] }
 0x14b   :  { %v1378_v4 = vpop.f32.mrf.mxu1 }
 0x14c   :  { %2080 = vmatpush.bf16.msra.mxu1 %v3366_v57  ;;  %2093 = vmatpush.bf16.msra.mxu2 %v3374_v58  ;;  %v1417_v7 = vpop.f32.mrf.mxu0  ;;  %v1403_v13 = vadd.f32 %v1402_v41, %v1390_v9  ;;  %v3398_v41 = vld [vmem:[#allocation10 + $0x130] sm:$0xff]  ;;  %v3396_v4 = vld [vmem:[#allocation10 + $0x120] sm:$0xff] }
 0x14d   :  { %v398_v7 = vperm.slane %v3681_v62, 3  ;;  %v3394_v9 = vld [vmem:[#allocation10 + $0x110] sm:$0xff] }
 0x14e   :  { %2106 = vmatpush.bf16.msra.mxu3 %v3382_v60  ;;  %v1416_v23 = vadd.f32 %v1415_v63, %v1403_v13  ;;  %2119 = vmatpush.bf16.msrb.mxu0 %v3390_v24 }
 0x150   :  { %2081 = vmatpush.bf16.msra.mxu1 %v3365_v61  ;;  %2094 = vmatpush.bf16.msra.mxu2 %v3373_v0  ;;  %v1679_v29 = vmax.f32 %v1416_v23, 0.0  ;;  %v3384_v0 = vld [vmem:[#allocation10 + $0xc0] sm:$0xff] }
 0x151   :  { %v1391_v14 = vpop.f32.mrf.mxu2 }
 0x152   :  { %2107 = vmatpush.bf16.msra.mxu3 %v3381_v34  ;;  %v1404_v15 = vpop.f32.mrf.mxu3  ;;  %v1685_v42 = vpack.c.bf16 %v1679_v29, %v1679_v29  ;;  %2120 = vmatpush.bf16.msrb.mxu0 %v3389_v33  ;;  %v3399_v34 = vld [vmem:[#allocation10 + $0x138] sm:$0xff]  ;;  %v3393_v14 = vld [vmem:[#allocation10 + $0x108] sm:$0xff] }
 0x153   :  { %v1428_v16 = vpop.f32.mrf.mxu1 }
 0x154   :  { %2082 = vmatpush.bf16.msra.mxu1 %v3364_v35  ;;  %2095 = vmatpush.bf16.msra.mxu2 %v3372_v40  ;;  %v1467_v20 = vpop.f32.mrf.mxu0  ;;  %v1429_v26 = vadd.f32 %v1428_v16, %v396_v19  ;;  %v3392_v19 = vld [vmem:[#allocation10 + $0x100] sm:$0xff] }
 0x156   :  { %2108 = vmatpush.bf16.msra.mxu3 %v3380_v5  ;;  %2121 = vmatpush.bf16.msrb.mxu0 %v3388_v44  ;;  %v3395_v5 = vld [vmem:[#allocation10 + $0x118] sm:$0xff] }
 0x158   :  { %2083 = vmatpush.bf16.msra.mxu1 %v3363_v6  ;;  %2096 = vmatpush.bf16.msra.mxu2 %v3371_v8 }
 0x159   :  { %v1441_v30 = vpop.f32.mrf.mxu2 }
 0x15a   :  { %2109 = vmatpush.bf16.msra.mxu3 %v3379_v10  ;;  %v1442_v31 = vadd.f32 %v1441_v30, %v1429_v26  ;;  %v1454_v32 = vpop.f32.mrf.mxu3  ;;  %2122 = vmatpush.bf16.msrb.mxu0 %v3387_v49  ;;  %v3405_v26 = vld [vmem:[#allocation10 + $0x168] sm:$0xff]  ;;  %v399_v30 = vperm.slane %v3681_v62, 4 }
 0x15b   :  { %v1430_v36 = vpop.f32.mrf.mxu1 }
 0x15c   :  { %2084 = vmatpush.bf16.msra.mxu1 %v3362_v11  ;;  %2097 = vmatpush.bf16.msra.mxu2 %v3370_v12  ;;  %v1455_v38 = vadd.f32 %v1454_v32, %v1442_v31  ;;  %v1469_v39 = vpop.f32.mrf.mxu0  ;;  %v3402_v32 = vld [vmem:[#allocation10 + $0x150] sm:$0xff] }
 0x15e   :  { %2110 = vmatpush.bf16.msra.mxu3 %v3378_v17  ;;  %v1468_v43 = vadd.f32 %v1467_v20, %v1455_v38  ;;  %2123 = vmatpush.bf16.msrb.mxu0 %v3386_v53  ;;  %v3407_v20 = vld [vmem:[#allocation10 + $0x178] sm:$0xff] }
 0x160   :  { %2085 = vmatpush.bf16.msra.mxu1 %v3361_v18  ;;  %2098 = vmatpush.bf16.msra.mxu2 %v3369_v21  ;;  %v1680_v45 = vmax.f32 %v1468_v43, 0.0 }
 0x161   :  { %v1443_v46 = vpop.f32.mrf.mxu2 }
 0x162   :  { %2111 = vmatpush.bf16.msra.mxu3 %v3377_v25  ;;  %v1686_v47 = vpack.c.bf16 %v1680_v45, %v1680_v45  ;;  %v1456_v48 = vpop.f32.mrf.mxu3  ;;  %2124 = vmatpush.bf16.msrb.mxu0 %v3385_v59  ;;  %v3406_v25 = vld [vmem:[#allocation10 + $0x170] sm:$0xff]  ;;  %v3400_v45 = vld [vmem:[#allocation10 + $0x140] sm:$0xff] }
 0x164   :  { %2086 = vmatpush.bf16.msra.mxu1 %v3360_v27  ;;  %2099 = vmatpush.bf16.msra.mxu2 %v3368_v28  ;;  %v1480_v50 = vpop.f32.mrf.mxu1  ;;  %v3404_v27 = vld [vmem:[#allocation10 + $0x160] sm:$0xff]  ;;  %v3403_v28 = vld [vmem:[#allocation10 + $0x158] sm:$0xff] }
 0x165   :  { %v1481_v54 = vadd.f32 %v1480_v50, %v397_v51 }
 0x166   :  { %2112 = vmatpush.bf16.msra.mxu3 %v3376_v37  ;;  %2125 = vmatpush.bf16.msrb.mxu0 %v3384_v0  ;;  %v3401_v37 = vld [vmem:[#allocation10 + $0x148] sm:$0xff] }
 0x167   :  { %2087 = vmatmul.bf16.vlgmr.msra.gmra.mxu1 %v1685_v42  ;;  %2100 = vmatmul.bf16.vlgmr.msra.gmra.mxu2 %v1686_v47  ;;  %v1519_v52 = vpop.f32.mrf.mxu0 }
 0x168   :  { %2131 = vmatpush.bf16.msrb.mxu1 %v3399_v34  ;;  %2144 = vmatpush.bf16.msrb.mxu2 %v3407_v20 }
 0x16a   :  { %v1493_v55 = vpop.f32.mrf.mxu2 }
 0x16b   :  { %v1494_v56 = vadd.f32 %v1493_v55, %v1481_v54 }
 0x16c   :  { %v1482_v58 = vpop.f32.mrf.mxu1  ;;  %2132 = vmatpush.bf16.msrb.mxu1 %v3398_v41  ;;  %2145 = vmatpush.bf16.msrb.mxu2 %v3406_v25 }
 0x16d   :  { %v1506_v57 = vpop.f32.mrf.mxu3 }
 0x16e   :  { %v1507_v60 = vadd.f32 %v1506_v57, %v1494_v56 }
 0x16f   :  { %v1521_v61 = vpop.f32.mrf.mxu0 }
 0x170   :  { %v1520_v63 = vadd.f32 %v1519_v52, %v1507_v60  ;;  %2133 = vmatpush.bf16.msrb.mxu1 %v3397_v3  ;;  %2146 = vmatpush.bf16.msrb.mxu2 %v3405_v26  ;;  %v400_v52 = vperm.slane %v3681_v62, 5 }
 0x172   :  { %v1681_v1 = vmax.f32 %v1520_v63, 0.0  ;;  %v1495_v35 = vpop.f32.mrf.mxu2 }
 0x174   :  { %v1687_v40 = vpack.c.bf16 %v1681_v1, %v1681_v1  ;;  %2134 = vmatpush.bf16.msrb.mxu1 %v3396_v4  ;;  %2147 = vmatpush.bf16.msrb.mxu2 %v3404_v27 }
 0x175   :  { %v1508_v2 = vpop.f32.mrf.mxu3 }
 0x176   :  { %2113 = vmatmul.bf16.vlgmr.msra.gmra.mxu3 %v1687_v40  ;;  %v3420_v40 = vld [vmem:[%s3701_s6] ss:$0 sm:$0xff] }
 0x178   :  { %2135 = vmatpush.bf16.msrb.mxu1 %v3395_v5  ;;  %2148 = vmatpush.bf16.msrb.mxu2 %v3403_v28 }
 0x17c   :  { %2136 = vmatpush.bf16.msrb.mxu1 %v3394_v9  ;;  %2149 = vmatpush.bf16.msrb.mxu2 %v3402_v32 }
 0x180   :  { %2137 = vmatpush.bf16.msrb.mxu1 %v3393_v14  ;;  %2150 = vmatpush.bf16.msrb.mxu2 %v3401_v37 }
 0x184   :  { %v1532_v6 = vpop.f32.mrf.mxu1  ;;  %2138 = vmatpush.bf16.msrb.mxu1 %v3392_v19  ;;  %2151 = vmatpush.bf16.msrb.mxu2 %v3400_v45 }
 0x185   :  { %v1533_v10 = vadd.f32 %v1532_v6, %v398_v7 }
 0x187   :  { %v1571_v8 = vpop.f32.mrf.mxu0 }
 0x18a   :  { %v1545_v11 = vpop.f32.mrf.mxu2 }
 0x18b   :  { %v1546_v12 = vadd.f32 %v1545_v11, %v1533_v10 }
 0x18c   :  { %v1534_v15 = vpop.f32.mrf.mxu1 }
 0x18d   :  { %v1558_v13 = vpop.f32.mrf.mxu3 }
 0x18e   :  { %v1559_v16 = vadd.f32 %v1558_v13, %v1546_v12 }
 0x18f   :  { %v1573_v17 = vpop.f32.mrf.mxu0 }
 0x190   :  { %v1572_v18 = vadd.f32 %v1571_v8, %v1559_v16 }
 0x192   :  { %v1682_v21 = vmax.f32 %v1572_v18, 0.0  ;;  %v1547_v22 = vpop.f32.mrf.mxu2 }
 0x194   :  { %v1688_v23 = vpack.c.bf16 %v1682_v21, %v1682_v21 }
 0x195   :  { %v1560_v24 = vpop.f32.mrf.mxu3 }
 0x196   :  { %2126 = vmatmul.bf16.vlgmr.msrb.gmra.mxu0 %v1688_v23 }
 0x1a4   :  { %v1584_v29 = vpop.f32.mrf.mxu1 }
 0x1a5   :  { %v1585_v33 = vadd.f32 %v1584_v29, %v399_v30 }
 0x1a7   :  { %v1623_v31 = vpop.f32.mrf.mxu0 }
 0x1aa   :  { %v1597_v36 = vpop.f32.mrf.mxu2 }
 0x1ab   :  { %v1598_v38 = vadd.f32 %v1597_v36, %v1585_v33 }
 0x1ac   :  { %v1586_v42 = vpop.f32.mrf.mxu1 }
 0x1ad   :  { %v1610_v39 = vpop.f32.mrf.mxu3 }
 0x1ae   :  { %v1611_v43 = vadd.f32 %v1610_v39, %v1598_v38 }
 0x1af   :  { %v1625_v44 = vpop.f32.mrf.mxu0 }
 0x1b0   :  { %v1624_v46 = vadd.f32 %v1623_v31, %v1611_v43 }
 0x1b2   :  { %v1683_v47 = vmax.f32 %v1624_v46, 0.0  ;;  %v1599_v48 = vpop.f32.mrf.mxu2 }
 0x1b4   :  { %v1689_v49 = vpack.c.bf16 %v1683_v47, %v1683_v47 }
 0x1b5   :  { %v1612_v50 = vpop.f32.mrf.mxu3 }
 0x1b6   :  { %2139 = vmatmul.bf16.vlgmr.msrb.gmra.mxu1 %v1689_v49 }
 0x1c4   :  { %v1636_v51 = vpop.f32.mrf.mxu1 }
 0x1c5   :  { %v1637_v54 = vadd.f32 %v1636_v51, %v400_v52 }
 0x1c6   :  { %v1675_v53 = vpop.f32.mrf.mxu0 }
 0x1ca   :  { %v1649_v55 = vpop.f32.mrf.mxu2 }
 0x1cb   :  { %v1650_v56 = vadd.f32 %v1649_v55, %v1637_v54 }
 0x1cc   :  { %v1662_v57 = vpop.f32.mrf.mxu3  ;;  %v1638_v58 = vpop.f32.mrf.mxu1 }
 0x1cd   :  { %v1663_v59 = vadd.f32 %v1662_v57, %v1650_v56 }
 0x1ce   :  { %v1677_v60 = vpop.f32.mrf.mxu0 }
 0x1cf   :  { %v1676_v61 = vadd.f32 %v1675_v53, %v1663_v59 }
 0x1d1   :  { %v1684_v63 = vmax.f32 %v1676_v61, 0.0 }
 0x1d2   :  { %v1651_v0 = vpop.f32.mrf.mxu2 }
 0x1d3   :  { %v1690_v1 = vpack.c.bf16 %v1684_v63, %v1684_v63 }
 0x1d4   :  { %v1664_v34 = vpop.f32.mrf.mxu3 }
 0x1d5   :  { %2152 = vmatmul.bf16.vlgmr.msrb.gmra.mxu2 %v1690_v1 }
 0x1e4   :  { %v2088_v35 = vpop.f32.mrf.mxu1 }
 0x1e5   :  { %v2089_v2 = vadd.f32 %v3420_v40, %v2088_v35 }
 0x1ea   :  { %v2101_v41 = vpop.f32.mrf.mxu2 }
 0x1eb   :  { %v2102_v3 = vadd.f32 %v2101_v41, %v2089_v2 }
 0x1ec   :  { %v2090_v62 = vpop.f32.mrf.mxu1 }
 0x1f2   :  { %v2103_v4 = vpop.f32.mrf.mxu2 }
 0x1f9   :  { %v2114_v5 = vpop.f32.mrf.mxu3 }
 0x1fa   :  { %v2115_v6 = vadd.f32 %v2114_v5, %v2102_v3 }
 0x201   :  { %v2116_v7 = vpop.f32.mrf.mxu3 }
 0x213   :  { %v2127_v8 = vpop.f32.mrf.mxu0 }
 0x214   :  { %v2128_v12 = vadd.f32 %v2127_v8, %v2115_v6 }
 0x21b   :  { %v2129_v9 = vpop.f32.mrf.mxu0 }
 0x233   :  { %v2140_v10 = vpop.f32.mrf.mxu1 }
 0x234   :  { %v2141_v13 = vadd.f32 %v2140_v10, %v2128_v12 }
 0x23b   :  { %v2142_v11 = vpop.f32.mrf.mxu1 }
 0x258   :  { %v2153_v14 = vpop.f32.mrf.mxu2 }
 0x259   :  { %v2154_v15 = vadd.f32 %v2153_v14, %v2141_v13 }
 0x25b   :  { %2157 = vst [vmem:[#allocation11] sm:$0x3] %v2154_v15 }
 0x25c   :  { %2168 = dma.vmem_to_hbm [thread:$0]  %s2164_s29, 32, %s2166_s9, [#allocation4]  }
 0x260   :  { %v2155_v16 = vpop.f32.mrf.mxu2 }
 0x261   :  { %3571 = dma.done.wait [#allocation4], 32  }
 0x262   :  { %3572 = vsyncadd [#allocation4], 4294967264 }
 0x263   :  { %2173 = vsyncpa [#allocation3], 1 }
 0x264   :  { %2174 = vsyncpa [#allocation6], 1 }
 0x265   :  { %2175 = vsyncpa [#allocation9], 1 }
 0x266   :  { %2176 = vsyncpa [#allocation4], 1 }

</bundles_post_ra>
